<compile_context>
chip_gen: v5e
topology: v5e:2x2
jax: 0.10.0
libtpu: 0.0.40
codegen_flags: <defaults>
</compile_context>

<pallas_src>
import numpy as np

import jax
import jax.numpy as jnp
from jax.experimental import pallas as pl
from jax.experimental.pallas import tpu as pltpu


# ----------------------------- weight folding -------------------------------
# Everything in this section runs ONCE per parameter set (outside the hot path).

def _conv3x3_out_hw(H, W, stride):
    return (H + 2 - 3) // stride + 1, (W + 2 - 3) // stride + 1


def _fold_conv_mix(w, H, W, stride, dtype):
    """Column-shift + channel-mix of a 3x3/pad-1 conv (PyTorch OIHW weights)
    folded into one stacked matrix M_big (3*W*Cin, Wo*Cout): with the three
    row-shifted copies of the (rows, W*Cin) activation laid side by side along
    lanes, the conv is  out = [tap0 | tap1 | tap2] @ M_big."""
    Cout, Cin, KH, KW = w.shape
    assert (KH, KW) == (3, 3)
    Ho, Wo = _conv3x3_out_hw(H, W, stride)
    sel = np.zeros((KW, W, Wo), np.float32)
    for k in range(KW):
        for j in range(Wo):
            src = stride * j + k - 1                      # padding=1
            if 0 <= src < W:
                sel[k, src, j] = 1.0
    wt = jnp.transpose(jnp.asarray(w, jnp.float32), (2, 3, 1, 0))  # (KH,KW,Cin,Cout)
    taps = [sum(jnp.kron(jnp.asarray(sel[kw]), wt[kh, kw]) for kw in range(KW))
            for kh in range(KH)]
    return jnp.concatenate(taps, axis=0).astype(dtype), Ho, Wo     # (3*W*Cin, Wo*Cout)


def _fold_row_shift(H, stride, TB, taps, dtype):
    """Batched row-shift matrices: kron(I_TB, r_k) with r_k the (Ho, H) 0/1
    matrix selecting source row stride*i + k - 1 (padding=1; out-of-range rows
    stay zero).  Only the taps listed in `taps` are materialised — the centre
    tap of a stride-1 conv is the identity and is skipped."""
    Ho = (H + 2 - 3) // stride + 1
    eye = np.eye(TB, dtype=np.float32)
    mats = []
    for k in taps:
        r = np.zeros((Ho, H), np.float32)
        for i in range(Ho):
            src = stride * i + k - 1
            if 0 <= src < H:
                r[i, src] = 1.0
        mats.append(np.kron(eye, r))
    return jnp.asarray(np.stack(mats), dtype)             # (len(taps), TB*Ho, TB*H)


def _fold_shortcut(w, H, W, stride, dtype):
    """1x1/stride-s/pad-0 shortcut folded into a (W*Cin, Wo*Cout) matrix.  It
    consumes the main conv's centre-tap rows: the centre tap of a pad-1
    stride-s 3x3 reads exactly rows stride*i, i.e. the 1x1 stride-s rows."""
    Ho3, Wo3 = _conv3x3_out_hw(H, W, stride)
    Ho1, Wo1 = (H - 1) // stride + 1, (W - 1) // stride + 1
    assert (Ho1, Wo1) == (Ho3, Wo3), "shortcut / main conv spatial dims differ"
    sel = np.zeros((W, Wo3), np.float32)
    for j in range(Wo3):
        sel[stride * j, j] = 1.0
    M = jnp.kron(jnp.asarray(sel), jnp.asarray(w[:, :, 0, 0], jnp.float32).T)
    return M.astype(dtype)


def _fold_head(lin_w, Hf, Wf, Cf, TB, ncls_pad, dtype):
    """F.avg_pool2d(out, 4) + Linear folded into two matrices:
        pooled = P @ a      P = kron(I_TB, ones(1, 4)/4)   (per-sample row mean)
        logits = pooled @ Q Q = kron(sel/4, lin_w.T)       (col mean + linear)
    Q is zero-padded to ncls_pad lanes so the output store is lane dense."""
    assert Hf == 4 and Wf == 4, (
        "avg_pool2d(4) folding assumes the final feature map is exactly one "
        "4x4 window (true for 16x16 inputs through two stride-2 blocks)")
    ncls = lin_w.shape[0]
    assert ncls <= ncls_pad
    P = np.kron(np.eye(TB, dtype=np.float32), np.full((1, Hf), 0.25, np.float32))
    sel = np.zeros((Wf, 1), np.float32)
    sel[:4, 0] = 0.25
    Q = jnp.kron(jnp.asarray(sel), jnp.asarray(lin_w, jnp.float32).T)   # (Wf*Cf, ncls)
    Qp = jnp.zeros((Wf * Cf, ncls_pad), jnp.float32).at[:, :ncls].set(Q)
    return jnp.asarray(P, dtype), Qp.astype(dtype)


def fold_params(params, height=16, width=16, *, batch_tile=8,
                compute_dtype=jnp.float32, ncls_pad=128):
    """One-time preprocessing of PyTorch-layout parameters into the constant
    operands + static plan consumed by the fused, batch-tiled Pallas kernel."""
    TB = batch_tile
    assert TB % 8 == 0, "batch_tile must be a multiple of 8 (sublane tiling)"
    dt = compute_dtype
    H, W = height, width

    operands, bias_rows, convs, blocks = [], [], [], []

    def add_op(arr):
        operands.append(arr)
        return len(operands) - 1

    def add_bias(vec, Wo):
        bias_rows.append(jnp.tile(jnp.asarray(vec, jnp.float32), Wo))
        return len(bias_rows) - 1

    def add_conv(w, b, Hin, Win, stride):
        Cout, Cin = w.shape[0], w.shape[1]
        M_big, Ho, Wo = _fold_conv_mix(w, Hin, Win, stride, dt)
        taps = (0, 2) if stride == 1 else (0, 1, 2)   # stride-1 centre tap == identity
        convs.append({
            "stride": stride,
            "in_w": Win * Cin,
            "out_w": Wo * Cout,
            # Lane-concat tap merge (1 big-K matmul) only where every concat
            # offset is vreg-aligned; narrower convs use the 8-aligned
            # row-sliced sum of the same stacked matrix (their K is tiny).
            "merge": (Win * Cin) % 128 == 0,
            "m_idx": add_op(M_big),
            "r_idx": add_op(_fold_row_shift(Hin, stride, TB, taps, dt)),
            "b_row": add_bias(b, Wo),
            "sc_idx": None,
            "sc_b_row": None,
        })
        return len(convs) - 1, Ho, Wo

    # Stem conv (1 -> hidden_dim, stride 1).
    stem_idx, H, W = add_conv(params["conv1_w"], params["conv1_b"], H, W, 1)
    last_cout = int(params["conv1_w"].shape[0])

    # BasicBlocks.
    for layer in params["layers"]:
        for bp in layer:
            s = bp["stride"]
            Hin, Win = H, W
            c1, Ho, Wo = add_conv(bp["conv1_w"], bp["conv1_b"], Hin, Win, s)
            if "sc_w" in bp:
                convs[c1]["sc_idx"] = add_op(_fold_shortcut(bp["sc_w"], Hin, Win, s, dt))
                convs[c1]["sc_b_row"] = add_bias(bp["sc_b"], Wo)
            c2, H, W = add_conv(bp["conv2_w"], bp["conv2_b"], Ho, Wo, 1)
            blocks.append((c1, c2))
            last_cout = int(bp["conv2_w"].shape[0])

    # Head: avg_pool2d(4) + Linear.
    Cf = int(params["lin_w"].shape[1])
    assert Cf == last_cout, "linear in_features must match the last conv width"
    P, Q = _fold_head(params["lin_w"], H, W, Cf, TB, ncls_pad, dt)
    p_idx, q_idx = add_op(P), add_op(Q)
    head_b_row = len(bias_rows)
    bias_rows.append(jnp.asarray(params["lin_b"], jnp.float32))

    # Pack every bias into a single lane-padded f32 array (one pallas input
    # instead of ~8); the kernel slices row / width statically.
    pack_w = max(max(int(r.shape[0]) for r in bias_rows), ncls_pad)
    pack_w = ((pack_w + 127) // 128) * 128
    bias_pack = jnp.zeros((len(bias_rows), pack_w), jnp.float32)
    for i, r in enumerate(bias_rows):
        bias_pack = bias_pack.at[i, : r.shape[0]].set(r)
    bias_idx = add_op(bias_pack)

    plan = {
        "convs": convs, "blocks": blocks, "stem": stem_idx,
        "p_idx": p_idx, "q_idx": q_idx, "head_b_row": head_b_row,
        "bias_idx": bias_idx, "tb": TB, "ncls_pad": ncls_pad,
        "ncls": int(params["lin_w"].shape[0]),
        "input_hw": (height, width),
        "compute_dtype": dt,
    }
    return {"operands": operands, "plan": plan}


# ----------------------------- fused Pallas kernel ---------------------------

def _const_index_map(ndim):
    def index_map(n):
        return (0,) * ndim
    return index_map


def _make_kernel(plan):
    convs, blocks = plan["convs"], plan["blocks"]
    cdt = np.dtype(plan["compute_dtype"])
    f32 = jnp.float32

    def kernel(*refs):
        x_ref, o_ref = refs[0], refs[-1]
        consts = refs[1:-1]
        bias_ref = consts[plan["bias_idx"]]

        def cast(v):                         # no-op on the f32 path / constants
            return v if v.dtype == cdt else v.astype(cdt)

        def mm(lhs, rhs):                    # MXU matmul, f32 accumulation
            return jnp.dot(cast(lhs), cast(rhs), preferred_element_type=f32)

        def bias(row, w):                    # f32 (1, w) slice of the bias pack
            return bias_ref[row:row + 1, :w]

        def conv3x3(a, d):
            """a: (TB*H, W*Cin) f32 -> (out (TB*Ho, Wo*Cout) f32, shortcut | None)."""
            R = consts[d["r_idx"]]
            if d["stride"] == 1:             # centre tap is the activation itself
                taps = [mm(R[0], a), a, mm(R[1], a)]
            else:                            # row shift + stride-2 row subsample
                taps = [mm(R[0], a), mm(R[1], a), mm(R[2], a)]
            ctr = taps[1]
            M = consts[d["m_idx"]]
            if d["merge"]:                   # one K = 3*W*Cin matmul
                out = mm(jnp.concatenate(taps, axis=1), M[...])
            else:                            # narrow conv: row-sliced tap sum
                wc = d["in_w"]
                out = sum(mm(t, M[k * wc:(k + 1) * wc, :]) for k, t in enumerate(taps))
            out = out + bias(d["b_row"], d["out_w"])
            sc = None
            if d["sc_idx"] is not None:      # fused 1x1 strided shortcut
                sc = mm(ctr, consts[d["sc_idx"]][...]) + bias(d["sc_b_row"], d["out_w"])
            return out, sc

        # Activations stay in VMEM/vregs for the whole network.
        a = x_ref[...].astype(f32)                          # (TB*H, W)   (Cin == 1)

        # Stem conv + ReLU.
        a = jnp.maximum(conv3x3(a, convs[plan["stem"]])[0], 0.0)

        # BasicBlocks.
        for c1, c2 in blocks:
            h, sc = conv3x3(a, convs[c1])
            identity = sc if convs[c1]["sc_idx"] is not None else a
            h = jnp.maximum(h, 0.0)                         # relu(conv1)
            h = conv3x3(h, convs[c2])[0]                    # conv2
            a = jnp.maximum(h + identity, 0.0)              # += identity; relu

        # avg_pool2d(4) + Linear -> lane-dense (TB, 128) logits block.
        pooled = mm(consts[plan["p_idx"]][...], a)
        logits = mm(pooled, consts[plan["q_idx"]][...])
        logits = logits + bias(plan["head_b_row"], plan["ncls_pad"])
        o_ref[...] = logits.astype(o_ref.dtype)

    return kernel


def mnist_resnet_forward_folded(folded, x_nchw):
    """Single-pallas_call forward pass. x_nchw: (N, 1, H, W) float32."""
    plan, consts = folded["plan"], folded["operands"]
    TB, (H, W) = plan["tb"], plan["input_hw"]
    ncls, ncls_pad = plan["ncls"], plan["ncls_pad"]

    N, Cin, Hx, Wx = x_nchw.shape
    assert Cin == 1, "MnistResNet's first conv expects a single input channel"
    assert (Hx, Wx) == (H, W), "input spatial size must match the folded params"

    n_pad = ((N + TB - 1) // TB) * TB                      # pad batch to a tile multiple
    x = x_nchw.reshape(N, H, W).astype(jnp.float32)
    if n_pad != N:
        x = jnp.concatenate([x, jnp.zeros((n_pad - N, H, W), jnp.float32)], axis=0)
    x2 = x.reshape(n_pad * H, W)                           # TB samples stacked along rows

    in_specs = [pl.BlockSpec((TB * H, W), lambda n: (n, 0))]
    in_specs += [pl.BlockSpec(c.shape, _const_index_map(c.ndim)) for c in consts]

    out = pl.pallas_call(
        _make_kernel(plan),
        out_shape=jax.ShapeDtypeStruct((n_pad, ncls_pad), jnp.float32),
        grid=(n_pad // TB,),
        in_specs=in_specs,
        out_specs=pl.BlockSpec((TB, ncls_pad), lambda n: (n, 0)),
        compiler_params=pltpu.CompilerParams(
            dimension_semantics=("parallel",)),            # batch tiles across TCs
    )(x2, *consts)
    return out[:N, :ncls]


def mnist_resnet_forward(params, x_nchw, *, batch_tile=8,
                         compute_dtype=jnp.bfloat16):
    """Convenience wrapper: folds params then runs the fused kernel.
    bf16 MXU operands (v6e/v7x native) by default, with f32 accumulation and a
    f32 bias/ReLU/residual epilogue; pass compute_dtype=jnp.float32 for exact
    PyTorch f32 semantics.  batch_tile=8 fills a 128-row MXU tile on v5e; use
    16-32 on v6e/v7x for large batches (keep >= 2 grid steps on v7x)."""
    folded = fold_params(params, x_nchw.shape[2], x_nchw.shape[3],
                         batch_tile=batch_tile, compute_dtype=compute_dtype)
    return mnist_resnet_forward_folded(folded, x_nchw)


# ----------------------------- params + reference ---------------------------

def init_params(key, hidden_dim=8, num_blocks=(1, 1), num_classes=10):
    """Parameters in PyTorch layouts: conv (Cout, Cin, kh, kw), linear (out, in)."""
    keys = iter(jax.random.split(key, 64))

    def w(shape, scale=0.1):
        return scale * jax.random.normal(next(keys), shape, jnp.float32)

    params = {"conv1_w": w((hidden_dim, 1, 3, 3)), "conv1_b": w((hidden_dim,))}
    in_ch = hidden_dim
    layers = []
    for mult, nb in zip((1, 2), num_blocks):
        out_ch = hidden_dim * mult
        strides = [2] + [1] * (nb - 1)
        blocks = []
        for s in strides:
            bp = {"stride": s,
                  "conv1_w": w((out_ch, in_ch, 3, 3)), "conv1_b": w((out_ch,)),
                  "conv2_w": w((out_ch, out_ch, 3, 3)), "conv2_b": w((out_ch,))}
            if s != 1 or in_ch != out_ch:
                bp["sc_w"] = w((out_ch, in_ch, 1, 1))
                bp["sc_b"] = w((out_ch,))
            blocks.append(bp)
            in_ch = out_ch
        layers.append(blocks)
    params["layers"] = layers
    params["lin_w"] = w((num_classes, hidden_dim * 2))
    params["lin_b"] = w((num_classes,))
    return params


def _ref_conv(x, w, b, stride, pad):
    out = jax.lax.conv_general_dilated(
        x, w, window_strides=(stride, stride),
        padding=((pad, pad), (pad, pad)),
        dimension_numbers=("NCHW", "OIHW", "NCHW"),
        precision=jax.lax.Precision.HIGHEST)
    return out + b.reshape(1, -1, 1, 1)


def mnist_resnet_reference(params, x):
    """Plain-JAX mirror of the PyTorch forward (for correctness checking)."""
    h = jax.nn.relu(_ref_conv(x, params["conv1_w"], params["conv1_b"], 1, 1))
    for blocks in params["layers"]:
        for bp in blocks:
            s = bp["stride"]
            identity = (_ref_conv(h, bp["sc_w"], bp["sc_b"], s, 0)
                        if "sc_w" in bp else h)
            o = jax.nn.relu(_ref_conv(h, bp["conv1_w"], bp["conv1_b"], s, 1))
            o = _ref_conv(o, bp["conv2_w"], bp["conv2_b"], 1, 1)
            h = jax.nn.relu(o + identity)
    pooled = jnp.mean(h[:, :, :4, :4], axis=(2, 3))        # F.avg_pool2d(out, 4)
    return pooled @ params["lin_w"].T + params["lin_b"]


if __name__ == "__main__":
    key = jax.random.PRNGKey(0)
    pkey, xkey = jax.random.split(key)
    params = init_params(pkey, hidden_dim=8, num_blocks=(1, 1), num_classes=10)
    # MnistResNet hard-codes 1 input channel; 16x16 spatial -> 4x4 before pool.
    # N=16 with TB=8 -> two parallel grid steps (feeds both v7x TensorCores).
    x = jax.random.normal(xkey, (16, 1, 16, 16), jnp.float32)

    ref = jax.block_until_ready(mnist_resnet_reference(params, x))

    # Exact-semantics path: f32 MXU operands.
    folded_f32 = fold_params(params, 16, 16, batch_tile=8,
                             compute_dtype=jnp.float32)
    out_f32 = jax.block_until_ready(mnist_resnet_forward_folded(folded_f32, x))
    assert out_f32.shape == (16, 10) and out_f32.dtype == jnp.float32
    err_f32 = float(jnp.max(jnp.abs(out_f32 - ref)))
    assert err_f32 < 5e-3, f"f32 kernel mismatch vs reference: {err_f32}"

    # bf16 MXU-operand path (v6e/v7x native), f32 accumulate + f32 epilogue.
    out_bf16 = jax.block_until_ready(mnist_resnet_forward(params, x))
    err_bf16 = float(jnp.max(jnp.abs(out_bf16 - ref)))
    assert err_bf16 < 1e-1, f"bf16 kernel mismatch vs reference: {err_bf16}"

    print("KERNEL_OK")
</pallas_src>

<mosaic_0001>
module attributes {stable_mosaic.version = 11 : i64} {
  func.func @kernel(%arg0: i32, %arg1: memref<128x16xf32, #tpu.memory_space<vmem>>, %arg2: memref<48x128xf32, #tpu.memory_space<vmem>>, %arg3: memref<2x128x128xf32, #tpu.memory_space<vmem>>, %arg4: memref<384x64xf32, #tpu.memory_space<vmem>>, %arg5: memref<3x64x128xf32, #tpu.memory_space<vmem>>, %arg6: memref<128x64xf32, #tpu.memory_space<vmem>>, %arg7: memref<192x64xf32, #tpu.memory_space<vmem>>, %arg8: memref<2x64x64xf32, #tpu.memory_space<vmem>>, %arg9: memref<192x64xf32, #tpu.memory_space<vmem>>, %arg10: memref<3x32x64xf32, #tpu.memory_space<vmem>>, %arg11: memref<64x64xf32, #tpu.memory_space<vmem>>, %arg12: memref<192x64xf32, #tpu.memory_space<vmem>>, %arg13: memref<2x32x32xf32, #tpu.memory_space<vmem>>, %arg14: memref<8x32xf32, #tpu.memory_space<vmem>>, %arg15: memref<64x128xf32, #tpu.memory_space<vmem>>, %arg16: memref<8x128xf32, #tpu.memory_space<vmem>>, %arg17: memref<8x128xf32, #tpu.memory_space<vmem>>) attributes {dimension_semantics = [#tpu.dimension_semantics<parallel>], iteration_bounds = array<i64: 2>, scalar_prefetch = 0 : i64, scratch_operands = 0 : i64, tpu.core_type = #tpu.core_type<tc>, window_params = [{transform_indices = @transform_0, window_bounds = array<i64: 128, 16>}, {pipeline_mode = #tpu.pipeline_mode<synchronous>, transform_indices = @transform_1, window_bounds = array<i64: 48, 128>}, {pipeline_mode = #tpu.pipeline_mode<synchronous>, transform_indices = @transform_2, window_bounds = array<i64: 2, 128, 128>}, {pipeline_mode = #tpu.pipeline_mode<synchronous>, transform_indices = @transform_3, window_bounds = array<i64: 384, 64>}, {pipeline_mode = #tpu.pipeline_mode<synchronous>, transform_indices = @transform_4, window_bounds = array<i64: 3, 64, 128>}, {pipeline_mode = #tpu.pipeline_mode<synchronous>, transform_indices = @transform_5, window_bounds = array<i64: 128, 64>}, {pipeline_mode = #tpu.pipeline_mode<synchronous>, transform_indices = @transform_6, window_bounds = array<i64: 192, 64>}, {pipeline_mode = #tpu.pipeline_mode<synchronous>, transform_indices = @transform_7, window_bounds = array<i64: 2, 64, 64>}, {pipeline_mode = #tpu.pipeline_mode<synchronous>, transform_indices = @transform_8, window_bounds = array<i64: 192, 64>}, {pipeline_mode = #tpu.pipeline_mode<synchronous>, transform_indices = @transform_9, window_bounds = array<i64: 3, 32, 64>}, {pipeline_mode = #tpu.pipeline_mode<synchronous>, transform_indices = @transform_10, window_bounds = array<i64: 64, 64>}, {pipeline_mode = #tpu.pipeline_mode<synchronous>, transform_indices = @transform_11, window_bounds = array<i64: 192, 64>}, {pipeline_mode = #tpu.pipeline_mode<synchronous>, transform_indices = @transform_12, window_bounds = array<i64: 2, 32, 32>}, {pipeline_mode = #tpu.pipeline_mode<synchronous>, transform_indices = @transform_13, window_bounds = array<i64: 8, 32>}, {pipeline_mode = #tpu.pipeline_mode<synchronous>, transform_indices = @transform_14, window_bounds = array<i64: 64, 128>}, {pipeline_mode = #tpu.pipeline_mode<synchronous>, transform_indices = @transform_15, window_bounds = array<i64: 8, 128>}, {transform_indices = @transform_16, window_bounds = array<i64: 8, 128>}]} {
    %c0 = arith.constant 0 : index
    %c0_0 = arith.constant 0 : index
    %0 = vector.load %arg1[%c0, %c0_0] : memref<128x16xf32, #tpu.memory_space<vmem>>, vector<128x16xf32>
    %c0_1 = arith.constant 0 : index
    %c0_2 = arith.constant 0 : index
    %c0_3 = arith.constant 0 : index
    %1 = vector.load %arg3[%c0_1, %c0_2, %c0_3] : memref<2x128x128xf32, #tpu.memory_space<vmem>>, vector<1x128x128xf32>
    %2 = vector.shape_cast %1 : vector<1x128x128xf32> to vector<128x128xf32>
    %cst = arith.constant dense<0.000000e+00> : vector<128x16xf32>
    %3 = tpu.matmul %2, %0, %cst {dimension_numbers = #tpu.dot_dimension_numbers<[1], [0], [0], [1], [0, 0, 1, 1], [], []>} : vector<128x128xf32>, vector<128x16xf32>, vector<128x16xf32> -> vector<128x16xf32>
    %c1 = arith.constant 1 : index
    %c0_4 = arith.constant 0 : index
    %c0_5 = arith.constant 0 : index
    %4 = vector.load %arg3[%c1, %c0_4, %c0_5] : memref<2x128x128xf32, #tpu.memory_space<vmem>>, vector<1x128x128xf32>
    %5 = vector.shape_cast %4 : vector<1x128x128xf32> to vector<128x128xf32>
    %cst_6 = arith.constant dense<0.000000e+00> : vector<128x16xf32>
    %6 = tpu.matmul %5, %0, %cst_6 {dimension_numbers = #tpu.dot_dimension_numbers<[1], [0], [0], [1], [0, 0, 1, 1], [], []>} : vector<128x128xf32>, vector<128x16xf32>, vector<128x16xf32> -> vector<128x16xf32>
    %c0_7 = arith.constant 0 : index
    %c0_8 = arith.constant 0 : index
    %7 = vector.load %arg2[%c0_7, %c0_8] : memref<48x128xf32, #tpu.memory_space<vmem>>, vector<16x128xf32>
    %cst_9 = arith.constant dense<0.000000e+00> : vector<128x128xf32>
    %8 = tpu.matmul %3, %7, %cst_9 {dimension_numbers = #tpu.dot_dimension_numbers<[1], [0], [0], [1], [0, 0, 1, 1], [], []>} : vector<128x16xf32>, vector<16x128xf32>, vector<128x128xf32> -> vector<128x128xf32>
    %cst_10 = arith.constant 0.000000e+00 : f32
    %9 = vector.broadcast %cst_10 : f32 to vector<128x128xf32>
    %10 = arith.addf %9, %8 : vector<128x128xf32>
    %c16 = arith.constant 16 : index
    %c0_11 = arith.constant 0 : index
    %11 = vector.load %arg2[%c16, %c0_11] : memref<48x128xf32, #tpu.memory_space<vmem>>, vector<16x128xf32>
    %cst_12 = arith.constant dense<0.000000e+00> : vector<128x128xf32>
    %12 = tpu.matmul %0, %11, %cst_12 {dimension_numbers = #tpu.dot_dimension_numbers<[1], [0], [0], [1], [0, 0, 1, 1], [], []>} : vector<128x16xf32>, vector<16x128xf32>, vector<128x128xf32> -> vector<128x128xf32>
    %13 = arith.addf %10, %12 : vector<128x128xf32>
    %c32 = arith.constant 32 : index
    %c0_13 = arith.constant 0 : index
    %14 = vector.load %arg2[%c32, %c0_13] : memref<48x128xf32, #tpu.memory_space<vmem>>, vector<16x128xf32>
    %cst_14 = arith.constant dense<0.000000e+00> : vector<128x128xf32>
    %15 = tpu.matmul %6, %14, %cst_14 {dimension_numbers = #tpu.dot_dimension_numbers<[1], [0], [0], [1], [0, 0, 1, 1], [], []>} : vector<128x16xf32>, vector<16x128xf32>, vector<128x128xf32> -> vector<128x128xf32>
    %16 = arith.addf %13, %15 : vector<128x128xf32>
    %c0_15 = arith.constant 0 : index
    %c0_16 = arith.constant 0 : index
    %17 = vector.load %arg16[%c0_15, %c0_16] : memref<8x128xf32, #tpu.memory_space<vmem>>, vector<1x128xf32>
    %18 = vector.broadcast %17 : vector<1x128xf32> to vector<128x128xf32>
    %19 = arith.addf %16, %18 : vector<128x128xf32>
    %cst_17 = arith.constant 0.000000e+00 : f32
    %20 = vector.broadcast %cst_17 : f32 to vector<128x128xf32>
    %21 = arith.maximumf %19, %20 : vector<128x128xf32>
    %c0_18 = arith.constant 0 : index
    %c0_19 = arith.constant 0 : index
    %c0_20 = arith.constant 0 : index
    %22 = vector.load %arg5[%c0_18, %c0_19, %c0_20] : memref<3x64x128xf32, #tpu.memory_space<vmem>>, vector<1x64x128xf32>
    %23 = vector.shape_cast %22 : vector<1x64x128xf32> to vector<64x128xf32>
    %cst_21 = arith.constant dense<0.000000e+00> : vector<64x128xf32>
    %24 = tpu.matmul %23, %21, %cst_21 {dimension_numbers = #tpu.dot_dimension_numbers<[1], [0], [0], [1], [0, 0, 1, 1], [], []>} : vector<64x128xf32>, vector<128x128xf32>, vector<64x128xf32> -> vector<64x128xf32>
    %c1_22 = arith.constant 1 : index
    %c0_23 = arith.constant 0 : index
    %c0_24 = arith.constant 0 : index
    %25 = vector.load %arg5[%c1_22, %c0_23, %c0_24] : memref<3x64x128xf32, #tpu.memory_space<vmem>>, vector<1x64x128xf32>
    %26 = vector.shape_cast %25 : vector<1x64x128xf32> to vector<64x128xf32>
    %cst_25 = arith.constant dense<0.000000e+00> : vector<64x128xf32>
    %27 = tpu.matmul %26, %21, %cst_25 {dimension_numbers = #tpu.dot_dimension_numbers<[1], [0], [0], [1], [0, 0, 1, 1], [], []>} : vector<64x128xf32>, vector<128x128xf32>, vector<64x128xf32> -> vector<64x128xf32>
    %c2 = arith.constant 2 : index
    %c0_26 = arith.constant 0 : index
    %c0_27 = arith.constant 0 : index
    %28 = vector.load %arg5[%c2, %c0_26, %c0_27] : memref<3x64x128xf32, #tpu.memory_space<vmem>>, vector<1x64x128xf32>
    %29 = vector.shape_cast %28 : vector<1x64x128xf32> to vector<64x128xf32>
    %cst_28 = arith.constant dense<0.000000e+00> : vector<64x128xf32>
    %30 = tpu.matmul %29, %21, %cst_28 {dimension_numbers = #tpu.dot_dimension_numbers<[1], [0], [0], [1], [0, 0, 1, 1], [], []>} : vector<64x128xf32>, vector<128x128xf32>, vector<64x128xf32> -> vector<64x128xf32>
    %31 = tpu.concatenate %24, %27, %30 in 1 : vector<64x128xf32>, vector<64x128xf32>, vector<64x128xf32> -> vector<64x384xf32>
    %c0_29 = arith.constant 0 : index
    %c0_30 = arith.constant 0 : index
    %32 = vector.load %arg4[%c0_29, %c0_30] : memref<384x64xf32, #tpu.memory_space<vmem>>, vector<384x64xf32>
    %cst_31 = arith.constant dense<0.000000e+00> : vector<64x64xf32>
    %33 = tpu.matmul %31, %32, %cst_31 {dimension_numbers = #tpu.dot_dimension_numbers<[1], [0], [0], [1], [0, 0, 1, 1], [], []>} : vector<64x384xf32>, vector<384x64xf32>, vector<64x64xf32> -> vector<64x64xf32>
    %c1_32 = arith.constant 1 : index
    %c0_33 = arith.constant 0 : index
    %34 = vector.load %arg16[%c1_32, %c0_33] : memref<8x128xf32, #tpu.memory_space<vmem>>, vector<1x64xf32>
    %35 = vector.broadcast %34 : vector<1x64xf32> to vector<64x64xf32>
    %36 = arith.addf %33, %35 : vector<64x64xf32>
    %c0_34 = arith.constant 0 : index
    %c0_35 = arith.constant 0 : index
    %37 = vector.load %arg6[%c0_34, %c0_35] : memref<128x64xf32, #tpu.memory_space<vmem>>, vector<128x64xf32>
    %cst_36 = arith.constant dense<0.000000e+00> : vector<64x64xf32>
    %38 = tpu.matmul %27, %37, %cst_36 {dimension_numbers = #tpu.dot_dimension_numbers<[1], [0], [0], [1], [0, 0, 1, 1], [], []>} : vector<64x128xf32>, vector<128x64xf32>, vector<64x64xf32> -> vector<64x64xf32>
    %c2_37 = arith.constant 2 : index
    %c0_38 = arith.constant 0 : index
    %39 = vector.load %arg16[%c2_37, %c0_38] : memref<8x128xf32, #tpu.memory_space<vmem>>, vector<1x64xf32>
    %40 = vector.broadcast %39 : vector<1x64xf32> to vector<64x64xf32>
    %41 = arith.addf %38, %40 : vector<64x64xf32>
    %cst_39 = arith.constant 0.000000e+00 : f32
    %42 = vector.broadcast %cst_39 : f32 to vector<64x64xf32>
    %43 = arith.maximumf %36, %42 : vector<64x64xf32>
    %c0_40 = arith.constant 0 : index
    %c0_41 = arith.constant 0 : index
    %c0_42 = arith.constant 0 : index
    %44 = vector.load %arg8[%c0_40, %c0_41, %c0_42] : memref<2x64x64xf32, #tpu.memory_space<vmem>>, vector<1x64x64xf32>
    %45 = vector.shape_cast %44 : vector<1x64x64xf32> to vector<64x64xf32>
    %cst_43 = arith.constant dense<0.000000e+00> : vector<64x64xf32>
    %46 = tpu.matmul %45, %43, %cst_43 {dimension_numbers = #tpu.dot_dimension_numbers<[1], [0], [0], [1], [0, 0, 1, 1], [], []>} : vector<64x64xf32>, vector<64x64xf32>, vector<64x64xf32> -> vector<64x64xf32>
    %c1_44 = arith.constant 1 : index
    %c0_45 = arith.constant 0 : index
    %c0_46 = arith.constant 0 : index
    %47 = vector.load %arg8[%c1_44, %c0_45, %c0_46] : memref<2x64x64xf32, #tpu.memory_space<vmem>>, vector<1x64x64xf32>
    %48 = vector.shape_cast %47 : vector<1x64x64xf32> to vector<64x64xf32>
    %cst_47 = arith.constant dense<0.000000e+00> : vector<64x64xf32>
    %49 = tpu.matmul %48, %43, %cst_47 {dimension_numbers = #tpu.dot_dimension_numbers<[1], [0], [0], [1], [0, 0, 1, 1], [], []>} : vector<64x64xf32>, vector<64x64xf32>, vector<64x64xf32> -> vector<64x64xf32>
    %c0_48 = arith.constant 0 : index
    %c0_49 = arith.constant 0 : index
    %50 = vector.load %arg7[%c0_48, %c0_49] : memref<192x64xf32, #tpu.memory_space<vmem>>, vector<64x64xf32>
    %cst_50 = arith.constant dense<0.000000e+00> : vector<64x64xf32>
    %51 = tpu.matmul %46, %50, %cst_50 {dimension_numbers = #tpu.dot_dimension_numbers<[1], [0], [0], [1], [0, 0, 1, 1], [], []>} : vector<64x64xf32>, vector<64x64xf32>, vector<64x64xf32> -> vector<64x64xf32>
    %cst_51 = arith.constant 0.000000e+00 : f32
    %52 = vector.broadcast %cst_51 : f32 to vector<64x64xf32>
    %53 = arith.addf %52, %51 : vector<64x64xf32>
    %c64 = arith.constant 64 : index
    %c0_52 = arith.constant 0 : index
    %54 = vector.load %arg7[%c64, %c0_52] : memref<192x64xf32, #tpu.memory_space<vmem>>, vector<64x64xf32>
    %cst_53 = arith.constant dense<0.000000e+00> : vector<64x64xf32>
    %55 = tpu.matmul %43, %54, %cst_53 {dimension_numbers = #tpu.dot_dimension_numbers<[1], [0], [0], [1], [0, 0, 1, 1], [], []>} : vector<64x64xf32>, vector<64x64xf32>, vector<64x64xf32> -> vector<64x64xf32>
    %56 = arith.addf %53, %55 : vector<64x64xf32>
    %c128 = arith.constant 128 : index
    %c0_54 = arith.constant 0 : index
    %57 = vector.load %arg7[%c128, %c0_54] : memref<192x64xf32, #tpu.memory_space<vmem>>, vector<64x64xf32>
    %cst_55 = arith.constant dense<0.000000e+00> : vector<64x64xf32>
    %58 = tpu.matmul %49, %57, %cst_55 {dimension_numbers = #tpu.dot_dimension_numbers<[1], [0], [0], [1], [0, 0, 1, 1], [], []>} : vector<64x64xf32>, vector<64x64xf32>, vector<64x64xf32> -> vector<64x64xf32>
    %59 = arith.addf %56, %58 : vector<64x64xf32>
    %c3 = arith.constant 3 : index
    %c0_56 = arith.constant 0 : index
    %60 = vector.load %arg16[%c3, %c0_56] : memref<8x128xf32, #tpu.memory_space<vmem>>, vector<1x64xf32>
    %61 = vector.broadcast %60 : vector<1x64xf32> to vector<64x64xf32>
    %62 = arith.addf %59, %61 : vector<64x64xf32>
    %63 = arith.addf %62, %41 : vector<64x64xf32>
    %cst_57 = arith.constant 0.000000e+00 : f32
    %64 = vector.broadcast %cst_57 : f32 to vector<64x64xf32>
    %65 = arith.maximumf %63, %64 : vector<64x64xf32>
    %c0_58 = arith.constant 0 : index
    %c0_59 = arith.constant 0 : index
    %c0_60 = arith.constant 0 : index
    %66 = vector.load %arg10[%c0_58, %c0_59, %c0_60] : memref<3x32x64xf32, #tpu.memory_space<vmem>>, vector<1x32x64xf32>
    %67 = vector.shape_cast %66 : vector<1x32x64xf32> to vector<32x64xf32>
    %cst_61 = arith.constant dense<0.000000e+00> : vector<32x64xf32>
    %68 = tpu.matmul %67, %65, %cst_61 {dimension_numbers = #tpu.dot_dimension_numbers<[1], [0], [0], [1], [0, 0, 1, 1], [], []>} : vector<32x64xf32>, vector<64x64xf32>, vector<32x64xf32> -> vector<32x64xf32>
    %c1_62 = arith.constant 1 : index
    %c0_63 = arith.constant 0 : index
    %c0_64 = arith.constant 0 : index
    %69 = vector.load %arg10[%c1_62, %c0_63, %c0_64] : memref<3x32x64xf32, #tpu.memory_space<vmem>>, vector<1x32x64xf32>
    %70 = vector.shape_cast %69 : vector<1x32x64xf32> to vector<32x64xf32>
    %cst_65 = arith.constant dense<0.000000e+00> : vector<32x64xf32>
    %71 = tpu.matmul %70, %65, %cst_65 {dimension_numbers = #tpu.dot_dimension_numbers<[1], [0], [0], [1], [0, 0, 1, 1], [], []>} : vector<32x64xf32>, vector<64x64xf32>, vector<32x64xf32> -> vector<32x64xf32>
    %c2_66 = arith.constant 2 : index
    %c0_67 = arith.constant 0 : index
    %c0_68 = arith.constant 0 : index
    %72 = vector.load %arg10[%c2_66, %c0_67, %c0_68] : memref<3x32x64xf32, #tpu.memory_space<vmem>>, vector<1x32x64xf32>
    %73 = vector.shape_cast %72 : vector<1x32x64xf32> to vector<32x64xf32>
    %cst_69 = arith.constant dense<0.000000e+00> : vector<32x64xf32>
    %74 = tpu.matmul %73, %65, %cst_69 {dimension_numbers = #tpu.dot_dimension_numbers<[1], [0], [0], [1], [0, 0, 1, 1], [], []>} : vector<32x64xf32>, vector<64x64xf32>, vector<32x64xf32> -> vector<32x64xf32>
    %c0_70 = arith.constant 0 : index
    %c0_71 = arith.constant 0 : index
    %75 = vector.load %arg9[%c0_70, %c0_71] : memref<192x64xf32, #tpu.memory_space<vmem>>, vector<64x64xf32>
    %cst_72 = arith.constant dense<0.000000e+00> : vector<32x64xf32>
    %76 = tpu.matmul %68, %75, %cst_72 {dimension_numbers = #tpu.dot_dimension_numbers<[1], [0], [0], [1], [0, 0, 1, 1], [], []>} : vector<32x64xf32>, vector<64x64xf32>, vector<32x64xf32> -> vector<32x64xf32>
    %cst_73 = arith.constant 0.000000e+00 : f32
    %77 = vector.broadcast %cst_73 : f32 to vector<32x64xf32>
    %78 = arith.addf %77, %76 : vector<32x64xf32>
    %c64_74 = arith.constant 64 : index
    %c0_75 = arith.constant 0 : index
    %79 = vector.load %arg9[%c64_74, %c0_75] : memref<192x64xf32, #tpu.memory_space<vmem>>, vector<64x64xf32>
    %cst_76 = arith.constant dense<0.000000e+00> : vector<32x64xf32>
    %80 = tpu.matmul %71, %79, %cst_76 {dimension_numbers = #tpu.dot_dimension_numbers<[1], [0], [0], [1], [0, 0, 1, 1], [], []>} : vector<32x64xf32>, vector<64x64xf32>, vector<32x64xf32> -> vector<32x64xf32>
    %81 = arith.addf %78, %80 : vector<32x64xf32>
    %c128_77 = arith.constant 128 : index
    %c0_78 = arith.constant 0 : index
    %82 = vector.load %arg9[%c128_77, %c0_78] : memref<192x64xf32, #tpu.memory_space<vmem>>, vector<64x64xf32>
    %cst_79 = arith.constant dense<0.000000e+00> : vector<32x64xf32>
    %83 = tpu.matmul %74, %82, %cst_79 {dimension_numbers = #tpu.dot_dimension_numbers<[1], [0], [0], [1], [0, 0, 1, 1], [], []>} : vector<32x64xf32>, vector<64x64xf32>, vector<32x64xf32> -> vector<32x64xf32>
    %84 = arith.addf %81, %83 : vector<32x64xf32>
    %c4 = arith.constant 4 : index
    %c0_80 = arith.constant 0 : index
    %85 = vector.load %arg16[%c4, %c0_80] : memref<8x128xf32, #tpu.memory_space<vmem>>, vector<1x64xf32>
    %86 = vector.broadcast %85 : vector<1x64xf32> to vector<32x64xf32>
    %87 = arith.addf %84, %86 : vector<32x64xf32>
    %c0_81 = arith.constant 0 : index
    %c0_82 = arith.constant 0 : index
    %88 = vector.load %arg11[%c0_81, %c0_82] : memref<64x64xf32, #tpu.memory_space<vmem>>, vector<64x64xf32>
    %cst_83 = arith.constant dense<0.000000e+00> : vector<32x64xf32>
    %89 = tpu.matmul %71, %88, %cst_83 {dimension_numbers = #tpu.dot_dimension_numbers<[1], [0], [0], [1], [0, 0, 1, 1], [], []>} : vector<32x64xf32>, vector<64x64xf32>, vector<32x64xf32> -> vector<32x64xf32>
    %c5 = arith.constant 5 : index
    %c0_84 = arith.constant 0 : index
    %90 = vector.load %arg16[%c5, %c0_84] : memref<8x128xf32, #tpu.memory_space<vmem>>, vector<1x64xf32>
    %91 = vector.broadcast %90 : vector<1x64xf32> to vector<32x64xf32>
    %92 = arith.addf %89, %91 : vector<32x64xf32>
    %cst_85 = arith.constant 0.000000e+00 : f32
    %93 = vector.broadcast %cst_85 : f32 to vector<32x64xf32>
    %94 = arith.maximumf %87, %93 : vector<32x64xf32>
    %c0_86 = arith.constant 0 : index
    %c0_87 = arith.constant 0 : index
    %c0_88 = arith.constant 0 : index
    %95 = vector.load %arg13[%c0_86, %c0_87, %c0_88] : memref<2x32x32xf32, #tpu.memory_space<vmem>>, vector<1x32x32xf32>
    %96 = vector.shape_cast %95 : vector<1x32x32xf32> to vector<32x32xf32>
    %cst_89 = arith.constant dense<0.000000e+00> : vector<32x64xf32>
    %97 = tpu.matmul %96, %94, %cst_89 {dimension_numbers = #tpu.dot_dimension_numbers<[1], [0], [0], [1], [0, 0, 1, 1], [], []>} : vector<32x32xf32>, vector<32x64xf32>, vector<32x64xf32> -> vector<32x64xf32>
    %c1_90 = arith.constant 1 : index
    %c0_91 = arith.constant 0 : index
    %c0_92 = arith.constant 0 : index
    %98 = vector.load %arg13[%c1_90, %c0_91, %c0_92] : memref<2x32x32xf32, #tpu.memory_space<vmem>>, vector<1x32x32xf32>
    %99 = vector.shape_cast %98 : vector<1x32x32xf32> to vector<32x32xf32>
    %cst_93 = arith.constant dense<0.000000e+00> : vector<32x64xf32>
    %100 = tpu.matmul %99, %94, %cst_93 {dimension_numbers = #tpu.dot_dimension_numbers<[1], [0], [0], [1], [0, 0, 1, 1], [], []>} : vector<32x32xf32>, vector<32x64xf32>, vector<32x64xf32> -> vector<32x64xf32>
    %c0_94 = arith.constant 0 : index
    %c0_95 = arith.constant 0 : index
    %101 = vector.load %arg12[%c0_94, %c0_95] : memref<192x64xf32, #tpu.memory_space<vmem>>, vector<64x64xf32>
    %cst_96 = arith.constant dense<0.000000e+00> : vector<32x64xf32>
    %102 = tpu.matmul %97, %101, %cst_96 {dimension_numbers = #tpu.dot_dimension_numbers<[1], [0], [0], [1], [0, 0, 1, 1], [], []>} : vector<32x64xf32>, vector<64x64xf32>, vector<32x64xf32> -> vector<32x64xf32>
    %cst_97 = arith.constant 0.000000e+00 : f32
    %103 = vector.broadcast %cst_97 : f32 to vector<32x64xf32>
    %104 = arith.addf %103, %102 : vector<32x64xf32>
    %c64_98 = arith.constant 64 : index
    %c0_99 = arith.constant 0 : index
    %105 = vector.load %arg12[%c64_98, %c0_99] : memref<192x64xf32, #tpu.memory_space<vmem>>, vector<64x64xf32>
    %cst_100 = arith.constant dense<0.000000e+00> : vector<32x64xf32>
    %106 = tpu.matmul %94, %105, %cst_100 {dimension_numbers = #tpu.dot_dimension_numbers<[1], [0], [0], [1], [0, 0, 1, 1], [], []>} : vector<32x64xf32>, vector<64x64xf32>, vector<32x64xf32> -> vector<32x64xf32>
    %107 = arith.addf %104, %106 : vector<32x64xf32>
    %c128_101 = arith.constant 128 : index
    %c0_102 = arith.constant 0 : index
    %108 = vector.load %arg12[%c128_101, %c0_102] : memref<192x64xf32, #tpu.memory_space<vmem>>, vector<64x64xf32>
    %cst_103 = arith.constant dense<0.000000e+00> : vector<32x64xf32>
    %109 = tpu.matmul %100, %108, %cst_103 {dimension_numbers = #tpu.dot_dimension_numbers<[1], [0], [0], [1], [0, 0, 1, 1], [], []>} : vector<32x64xf32>, vector<64x64xf32>, vector<32x64xf32> -> vector<32x64xf32>
    %110 = arith.addf %107, %109 : vector<32x64xf32>
    %c6 = arith.constant 6 : index
    %c0_104 = arith.constant 0 : index
    %111 = vector.load %arg16[%c6, %c0_104] : memref<8x128xf32, #tpu.memory_space<vmem>>, vector<1x64xf32>
    %112 = vector.broadcast %111 : vector<1x64xf32> to vector<32x64xf32>
    %113 = arith.addf %110, %112 : vector<32x64xf32>
    %114 = arith.addf %113, %92 : vector<32x64xf32>
    %cst_105 = arith.constant 0.000000e+00 : f32
    %115 = vector.broadcast %cst_105 : f32 to vector<32x64xf32>
    %116 = arith.maximumf %114, %115 : vector<32x64xf32>
    %c0_106 = arith.constant 0 : index
    %c0_107 = arith.constant 0 : index
    %117 = vector.load %arg14[%c0_106, %c0_107] : memref<8x32xf32, #tpu.memory_space<vmem>>, vector<8x32xf32>
    %cst_108 = arith.constant dense<0.000000e+00> : vector<8x64xf32>
    %118 = tpu.matmul %117, %116, %cst_108 {dimension_numbers = #tpu.dot_dimension_numbers<[1], [0], [0], [1], [0, 0, 1, 1], [], []>} : vector<8x32xf32>, vector<32x64xf32>, vector<8x64xf32> -> vector<8x64xf32>
    %c0_109 = arith.constant 0 : index
    %c0_110 = arith.constant 0 : index
    %119 = vector.load %arg15[%c0_109, %c0_110] : memref<64x128xf32, #tpu.memory_space<vmem>>, vector<64x128xf32>
    %cst_111 = arith.constant dense<0.000000e+00> : vector<8x128xf32>
    %120 = tpu.matmul %118, %119, %cst_111 {dimension_numbers = #tpu.dot_dimension_numbers<[1], [0], [0], [1], [0, 0, 1, 1], [], []>} : vector<8x64xf32>, vector<64x128xf32>, vector<8x128xf32> -> vector<8x128xf32>
    %c7 = arith.constant 7 : index
    %c0_112 = arith.constant 0 : index
    %121 = vector.load %arg16[%c7, %c0_112] : memref<8x128xf32, #tpu.memory_space<vmem>>, vector<1x128xf32>
    %122 = vector.broadcast %121 : vector<1x128xf32> to vector<8x128xf32>
    %123 = arith.addf %120, %122 : vector<8x128xf32>
    %c0_113 = arith.constant 0 : index
    %c0_114 = arith.constant 0 : index
    %124 = vector.load %arg17[%c0_113, %c0_114] : memref<8x128xf32, #tpu.memory_space<vmem>>, vector<8x128xf32>
    tpu.vector_store %arg17[%c0_113, %c0_114], %123 {strides = array<i32>} : memref<8x128xf32, #tpu.memory_space<vmem>>, vector<8x128xf32>,
    return
  }
  func.func @transform_0(%arg0: i32) -> (i32, i32) {
    %c0_i32 = arith.constant 0 : i32
    %c0_i32_0 = arith.constant 0 : i32
    return %arg0, %c0_i32 : i32, i32
  }
  func.func @transform_1(%arg0: i32) -> (i32, i32) {
    %c0_i32 = arith.constant 0 : i32
    %c0_i32_0 = arith.constant 0 : i32
    %c0_i32_1 = arith.constant 0 : i32
    return %c0_i32, %c0_i32_0 : i32, i32
  }
  func.func @transform_2(%arg0: i32) -> (i32, i32, i32) {
    %c0_i32 = arith.constant 0 : i32
    %c0_i32_0 = arith.constant 0 : i32
    %c0_i32_1 = arith.constant 0 : i32
    %c0_i32_2 = arith.constant 0 : i32
    return %c0_i32, %c0_i32_0, %c0_i32_1 : i32, i32, i32
  }
  func.func @transform_3(%arg0: i32) -> (i32, i32) {
    %c0_i32 = arith.constant 0 : i32
    %c0_i32_0 = arith.constant 0 : i32
    %c0_i32_1 = arith.constant 0 : i32
    return %c0_i32, %c0_i32_0 : i32, i32
  }
  func.func @transform_4(%arg0: i32) -> (i32, i32, i32) {
    %c0_i32 = arith.constant 0 : i32
    %c0_i32_0 = arith.constant 0 : i32
    %c0_i32_1 = arith.constant 0 : i32
    %c0_i32_2 = arith.constant 0 : i32
    return %c0_i32, %c0_i32_0, %c0_i32_1 : i32, i32, i32
  }
  func.func @transform_5(%arg0: i32) -> (i32, i32) {
    %c0_i32 = arith.constant 0 : i32
    %c0_i32_0 = arith.constant 0 : i32
    %c0_i32_1 = arith.constant 0 : i32
    return %c0_i32, %c0_i32_0 : i32, i32
  }
  func.func @transform_6(%arg0: i32) -> (i32, i32) {
    %c0_i32 = arith.constant 0 : i32
    %c0_i32_0 = arith.constant 0 : i32
    %c0_i32_1 = arith.constant 0 : i32
    return %c0_i32, %c0_i32_0 : i32, i32
  }
  func.func @transform_7(%arg0: i32) -> (i32, i32, i32) {
    %c0_i32 = arith.constant 0 : i32
    %c0_i32_0 = arith.constant 0 : i32
    %c0_i32_1 = arith.constant 0 : i32
    %c0_i32_2 = arith.constant 0 : i32
    return %c0_i32, %c0_i32_0, %c0_i32_1 : i32, i32, i32
  }
  func.func @transform_8(%arg0: i32) -> (i32, i32) {
    %c0_i32 = arith.constant 0 : i32
    %c0_i32_0 = arith.constant 0 : i32
    %c0_i32_1 = arith.constant 0 : i32
    return %c0_i32, %c0_i32_0 : i32, i32
  }
  func.func @transform_9(%arg0: i32) -> (i32, i32, i32) {
    %c0_i32 = arith.constant 0 : i32
    %c0_i32_0 = arith.constant 0 : i32
    %c0_i32_1 = arith.constant 0 : i32
    %c0_i32_2 = arith.constant 0 : i32
    return %c0_i32, %c0_i32_0, %c0_i32_1 : i32, i32, i32
  }
  func.func @transform_10(%arg0: i32) -> (i32, i32) {
    %c0_i32 = arith.constant 0 : i32
    %c0_i32_0 = arith.constant 0 : i32
    %c0_i32_1 = arith.constant 0 : i32
    return %c0_i32, %c0_i32_0 : i32, i32
  }
  func.func @transform_11(%arg0: i32) -> (i32, i32) {
    %c0_i32 = arith.constant 0 : i32
    %c0_i32_0 = arith.constant 0 : i32
    %c0_i32_1 = arith.constant 0 : i32
    return %c0_i32, %c0_i32_0 : i32, i32
  }
  func.func @transform_12(%arg0: i32) -> (i32, i32, i32) {
    %c0_i32 = arith.constant 0 : i32
    %c0_i32_0 = arith.constant 0 : i32
    %c0_i32_1 = arith.constant 0 : i32
    %c0_i32_2 = arith.constant 0 : i32
    return %c0_i32, %c0_i32_0, %c0_i32_1 : i32, i32, i32
  }
  func.func @transform_13(%arg0: i32) -> (i32, i32) {
    %c0_i32 = arith.constant 0 : i32
    %c0_i32_0 = arith.constant 0 : i32
    %c0_i32_1 = arith.constant 0 : i32
    return %c0_i32, %c0_i32_0 : i32, i32
  }
  func.func @transform_14(%arg0: i32) -> (i32, i32) {
    %c0_i32 = arith.constant 0 : i32
    %c0_i32_0 = arith.constant 0 : i32
    %c0_i32_1 = arith.constant 0 : i32
    return %c0_i32, %c0_i32_0 : i32, i32
  }
  func.func @transform_15(%arg0: i32) -> (i32, i32) {
    %c0_i32 = arith.constant 0 : i32
    %c0_i32_0 = arith.constant 0 : i32
    %c0_i32_1 = arith.constant 0 : i32
    return %c0_i32, %c0_i32_0 : i32, i32
  }
  func.func @transform_16(%arg0: i32) -> (i32, i32) {
    %c0_i32 = arith.constant 0 : i32
    %c0_i32_0 = arith.constant 0 : i32
    return %arg0, %c0_i32 : i32, i32
  }
}

</mosaic_0001>

<bundles_post_ra>
// kernel: tpu_custom_call.1
= control target key start
LH: loop header
LB: loop body
LE: loop exit
PB: predicated region body
PF: predicated region fallthrough
CT: control target
= control target key end

     0   :  { %s4186_s0 = inlined_call_operand.vmem [shape: f32[256,16], index: 0, kind: input, shape index: {}]   ;;  %s4187_s1 = inlined_call_operand.vmem [shape: f32[48,128], index: 1, kind: input, shape index: {}]   ;;  %s4188_s2 = inlined_call_operand.vmem [shape: f32[2,128,128], index: 2, kind: input, shape index: {}]   ;;  %s4189_s3 = inlined_call_operand.vmem [shape: f32[384,64], index: 3, kind: input, shape index: {}]   ;;  %s4190_s4 = inlined_call_operand.vmem [shape: f32[3,64,128], index: 4, kind: input, shape index: {}]   ;;  %s4191_s5 = inlined_call_operand.vmem [shape: f32[128,64], index: 5, kind: input, shape index: {}]   ;;  %s4192_s6 = inlined_call_operand.vmem [shape: f32[192,64], index: 6, kind: input, shape index: {}]   ;;  %s4193_s7 = inlined_call_operand.vmem [shape: f32[2,64,64], index: 7, kind: input, shape index: {}]   ;;  %s4194_s8 = inlined_call_operand.vmem [shape: f32[192,64], index: 8, kind: input, shape index: {}]   ;;  %s4195_s9 = inlined_call_operand.vmem [shape: f32[3,32,64], index: 9, kind: input, shape index: {}]   ;;  %s4196_s10 = inlined_call_operand.vmem [shape: f32[64,64], index: 10, kind: input, shape index: {}]   ;;  %s4197_s11 = inlined_call_operand.vmem [shape: f32[192,64], index: 11, kind: input, shape index: {}]   ;;  %s4198_s12 = inlined_call_operand.vmem [shape: f32[2,32,32], index: 12, kind: input, shape index: {}]   ;;  %s4199_s13 = inlined_call_operand.vmem [shape: f32[8,32], index: 13, kind: input, shape index: {}]   ;;  %s4200_s14 = inlined_call_operand.vmem [shape: f32[64,128], index: 14, kind: input, shape index: {}]   ;;  %s4201_s15 = inlined_call_operand.vmem [shape: f32[8,128], index: 15, kind: input, shape index: {}]   ;;  %s4202_s16 = inlined_call_operand.hbm [shape: f32[16,128], index: 16, kind: output, shape index: {}]  }
   0x1   :  { %4207 = sst [smem:[#allocation9_spill]] %s4186_s0 }
   0x2   :  { %4208 = sst [smem:[#allocation10_spill]] %s4187_s1 }
   0x3   :  { %4209 = sst [smem:[#allocation11_spill]] %s4188_s2 }
   0x4   :  { %4210 = sst [smem:[#allocation12_spill]] %s4189_s3 }
   0x5   :  { %21 = vsyncpa [#allocation3], 0 }
   0x6   :  { %23 = vsyncpa [#allocation3 + $0x1], 0  ;;  %s3027_s21 = smov 0   ;;  %s3029_s22 = smov 0  }
   0x7   :  { %s3031_s23 = smov 0   ;;  %s3033_s24 = smov 0  }
   0x8 LB: > { %4211 = sst [smem:[#allocation5_spill]] %s2936_s23  ;;  %s3048_s25 = sadd.s32 4294967295, %s2940_s24   ;;  %s2940_s24 = sphi %s3033_s24, %s4222_s24   ;;  %s2936_s23 = sphi %s3031_s23, %s4224_s23   ;;  %s2932_s22 = sphi %s3029_s22, %s4226_s22   ;;  %s2928_s21 = sphi %s3027_s21, %s4225_s21  }
   0x9   : > { %s2614_s26 = sadd.s32 4294967294, %s2940_s24   ;;  %s3052_s27 = sadd.s32 1, %s2940_s24  }
   0xa   : > { %4212 = sst [smem:[#allocation6_spill]] %s3052_s27  ;;  %s377_s28 = sadd.s32 1, %s2936_s23 }
   0xb   : > { %s374_s29 = ssub.s32 %s2940_s24, %s3052_s27  ;;  %p387_p0 = scmp.ne.s32.totalorder %s2936_s23, %s2932_s22 }
   0xc   : > { %p375_p1 = scmp.eq.s32.totalorder %s374_s29, 0  ;;  %p388_p2 = scmp.eq.s32.totalorder %s3048_s25, 1 }
   0xd   : > { %p393_p3 = scmp.ne.s32.totalorder %s2932_s22, %s2928_s21  ;;  %p394_p4 = scmp.eq.s32.totalorder %s2614_s26, 1 }
   0xe   : > { %s3063_s30 = scalar_select %p375_p1, %s2936_s23, %s377_s28  }
   0xf   : > { %p3065_p5 = por %p388_p2, %p387_p0  ;;  %p3069_p6 = por %p394_p4, %p393_p3 }
  0x10   : > { %4213 = sst [smem:[#allocation7_spill]] %s3063_s30  ;;  %p2617_p7 = scmp.ge.s32.totalorder %s2940_s24, 1 }
  0x11   : > { %s4215_s17 = scalar_select %p3069_p6, 1, 0 }
  0x12   : > { %p466_p8 = scmp.lt.s32.totalorder %s2940_s24, 3 }
  0x13   : > { %4216 = sst [smem:[#allocation8_spill]] %s4215_s17 }
  0x14   : > { %p467_p9 = pnand %p2617_p7, %p466_p8 }
  0x15   : > { %s2619_s18 = sshll.u32 (!%p467_p9), %s3048_s25, 4  ;;  %s4217_s1 = sld [smem:[#allocation10_spill]] (!%p467_p9) }
  0x16   : > { %470 = sbr.rel (%p467_p9) target bundleno = 2054 (0x806), region = 84  ;;  %p517_p10 = scmp.lt.s32.totalorder (!%p467_p9), %s2619_s18, 31 }
  0x17   : > { %s4218_s27 = sld [smem:[#allocation9_spill]] (!%p467_p9)  ;;  %s513_s19 = sand.u32 (!%p467_p9), 1, %s2932_s22  }
  0x18   : > { %s4219_s2 = sld [smem:[#allocation11_spill]] (!%p467_p9)  ;;  %s2618_s20 = sshll.u32 (!%p467_p9), %s513_s19, 3 }
  0x19   : > { %s4220_s3 = sld [smem:[#allocation12_spill]] (!%p467_p9)  ;;  %s2898_s29 = scalar_lea.hbm (!%p467_p9), %s4202_s16, 16 }
  0x1b   : > { %s4228_s18 = smov (!%p517_p10, %s2619_s18), 31  ;;  %v704_v0 = vld [vmem:[%s4217_s1 + $0x18] sm:$0xff]  ;;  %v703_v1 = vld [vmem:[%s4217_s1 + $0x10] sm:$0xff]  ;;  %vm705_vm0 = vcmask 130048   ;;  %v933_v36 = vld [vmem:[%s4217_s1 + $0x28] sm:$0xff]  ;;  %vm1494_vm1 = vcmask 523264  }
  0x1c   : > { %768 = vmatpush.msra.mxu2 %v704_v0  ;;  %s2620_s26 = sshll.u32 %s4228_s18, 3  ;;  %v702_v43 = vld [vmem:[%s4217_s1 + $0x8] sm:$0xff]  ;;  %v701_v44 = vld [vmem:[%s4217_s1] sm:$0xff]  ;;  %vm2228_vm2 = vcmask 261120   ;;  %s515_s18 = scalar_lea.vmem [#allocation2], %s2618_s20 }
  0x1d   : > { %s3085_s17 = scalar_lea.vmem %s4218_s27, %s2620_s26  ;;  %881 = vmatpush.msra.mxu3 %v702_v43  ;;  %v932_v47 = vld [vmem:[%s4217_s1 + $0x20] sm:$0xff]  ;;  %s2812_s26 = sshll.u32 %s3048_s25, 3 }
  0x1e   : > { %769 = vmatpush.msra.mxu2 %v703_v1  ;;  %v3088_v2 = vld [vmem:[%s3085_s17 + $0x78] sm:$0xff]  ;;  %v3091_v3 = vld [vmem:[%s3085_s17 + $0x70] sm:$0xff]  ;;  %v3096_v4 = vld [vmem:[%s3085_s17 + $0x68] sm:$0xff]  ;;  %s2550_s23 = scalar_lea.hbm %s4202_s16, %s2812_s26  ;;  %s2552_s1 = sshll.u32 %s515_s18, 4  ;;  %s2553_s1 = int_to_ptr.vmem [resolvable:$true] %s2552_s1 }
  0x1f   : > { %554 = vmatpush.msra.mxu0 %v3088_v2  ;;  %636 = vmatpush.msra.mxu1 %v3088_v2  ;;  %v3101_v5 = vld [vmem:[%s3085_s17 + $0x60] sm:$0xff]  ;;  %v3107_v7 = vld [vmem:[%s3085_s17 + $0x58] sm:$0xff]  ;;  %v3113_v8 = vld [vmem:[%s3085_s17 + $0x50] sm:$0xff] }
  0x20   : > { %v522_v6 = vld [vmem:[%s3085_s17] sm:$0xff]  ;;  %v3118_v9 = vld [vmem:[%s3085_s17 + $0x48] sm:$0xff]  ;;  %v529_v12 = vld [vmem:[%s3085_s17 + $0x38] sm:$0xff]  ;;  %996 = vmatpush.msrb.mxu2 %v933_v36  ;;  %882 = vmatpush.msra.mxu3 %v701_v44 }
  0x21   : > { %555 = vmatpush.msra.mxu0 %v3091_v3  ;;  %637 = vmatpush.msra.mxu1 %v3091_v3  ;;  %v530_v10 = vld [vmem:[%s3085_s17 + $0x40] sm:$0xff]  ;;  %v523_v11 = vld [vmem:[%s3085_s17 + $0x8] sm:$0xff]  ;;  %v528_v13 = vld [vmem:[%s3085_s17 + $0x30] sm:$0xff] }
  0x22   : > { %2637 = vmatmul.msk.f32.vlgmr.msra.gmra.mxu2 %vm705_vm0, %v522_v6  ;;  %v527_v14 = vld [vmem:[%s3085_s17 + $0x28] sm:$0xff]  ;;  %v526_v15 = vld [vmem:[%s3085_s17 + $0x20] sm:$0xff]  ;;  %v524_v16 = vld [vmem:[%s3085_s17 + $0x10] sm:$0xff] }
  0x23   : > { %556 = vmatpush.msra.mxu0 %v3096_v4  ;;  %638 = vmatpush.msra.mxu1 %v3096_v4  ;;  %v525_v17 = vld [vmem:[%s3085_s17 + $0x18] sm:$0xff]  ;;  %v538_v18 = vld [vmem:[%s4219_s2] sm:$0xff]  ;;  %v539_v20 = vld [vmem:[%s4219_s2 + $0x8] sm:$0xff]  ;;  %s2554_s17 = sshll.u32 %s2550_s23, 4  ;;  %s2555_s17 = int_to_ptr.hbm [resolvable:$true] %s2554_s17 }
  0x24   : > { %v2621_v19 = vld [vmem:[%s4219_s2 + $0x80] sm:$0xff]  ;;  %v2622_v21 = vld [vmem:[%s4219_s2 + $0x88] sm:$0xff]  ;;  %v540_v22 = vld [vmem:[%s4219_s2 + $0x10] sm:$0xff]  ;;  %997 = vmatpush.msrb.mxu2 %v932_v47 }
  0x25   : > { %557 = vmatpush.msra.mxu0 %v3101_v5  ;;  %639 = vmatpush.msra.mxu1 %v3101_v5  ;;  %v2623_v23 = vld [vmem:[%s4219_s2 + $0x90] sm:$0xff]  ;;  %v541_v24 = vld [vmem:[%s4219_s2 + $0x18] sm:$0xff]  ;;  %v542_v26 = vld [vmem:[%s4219_s2 + $0x20] sm:$0xff] }
  0x26   : > { %v2624_v25 = vld [vmem:[%s4219_s2 + $0x98] sm:$0xff]  ;;  %v2625_v27 = vld [vmem:[%s4219_s2 + $0xa0] sm:$0xff]  ;;  %v543_v28 = vld [vmem:[%s4219_s2 + $0x28] sm:$0xff] }
  0x27   : > { %558 = vmatpush.msra.mxu0 %v3107_v7  ;;  %640 = vmatpush.msra.mxu1 %v3107_v7  ;;  %v2626_v29 = vld [vmem:[%s4219_s2 + $0xa8] sm:$0xff]  ;;  %v544_v30 = vld [vmem:[%s4219_s2 + $0x30] sm:$0xff]  ;;  %v545_v32 = vld [vmem:[%s4219_s2 + $0x38] sm:$0xff] }
  0x28   : > { %v2627_v31 = vld [vmem:[%s4219_s2 + $0xb0] sm:$0xff]  ;;  %v2628_v33 = vld [vmem:[%s4219_s2 + $0xb8] sm:$0xff]  ;;  %v546_v34 = vld [vmem:[%s4219_s2 + $0x40] sm:$0xff] }
  0x29   : > { %559 = vmatpush.msra.mxu0 %v3113_v8  ;;  %641 = vmatpush.msra.mxu1 %v3113_v8  ;;  %v2629_v35 = vld [vmem:[%s4219_s2 + $0xc0] sm:$0xff]  ;;  %v547_v37 = vld [vmem:[%s4219_s2 + $0x48] sm:$0xff]  ;;  %v548_v39 = vld [vmem:[%s4219_s2 + $0x50] sm:$0xff] }
  0x2a   : > { %2638 = vmatmul.msk.f32.gmra.mxu2 %vm705_vm0, %v523_v11  ;;  %v2630_v38 = vld [vmem:[%s4219_s2 + $0xc8] sm:$0xff]  ;;  %v2631_v40 = vld [vmem:[%s4219_s2 + $0xd0] sm:$0xff]  ;;  %v549_v41 = vld [vmem:[%s4219_s2 + $0x58] sm:$0xff] }
  0x2b   : > { %560 = vmatpush.msra.mxu0 %v3118_v9  ;;  %642 = vmatpush.msra.mxu1 %v3118_v9  ;;  %v2632_v42 = vld [vmem:[%s4219_s2 + $0xd8] sm:$0xff]  ;;  %v550_v45 = vld [vmem:[%s4219_s2 + $0x60] sm:$0xff]  ;;  %v551_v48 = vld [vmem:[%s4219_s2 + $0x68] sm:$0xff] }
  0x2c   : > { %v2633_v46 = vld [vmem:[%s4219_s2 + $0xe0] sm:$0xff]  ;;  %v2634_v49 = vld [vmem:[%s4219_s2 + $0xe8] sm:$0xff]  ;;  %v552_v51 = vld [vmem:[%s4219_s2 + $0x70] sm:$0xff] }
  0x2d   : > { %561 = vmatpush.msra.mxu0 %v530_v10  ;;  %643 = vmatpush.msra.mxu1 %v530_v10  ;;  %v2635_v52 = vld [vmem:[%s4219_s2 + $0xf0] sm:$0xff]  ;;  %v553_v54 = vld [vmem:[%s4219_s2 + $0x78] sm:$0xff] }
  0x2e   : > { %v2636_v55 = vld [vmem:[%s4219_s2 + $0xf8] sm:$0xff]  ;;  %s2540_s2 = scalar_lea.sflag [#allocation3], %s513_s19 }
  0x2f   : > { %562 = vmatpush.msra.mxu0 %v529_v12  ;;  %644 = vmatpush.msra.mxu1 %v529_v12 }
  0x31   : > { %563 = vmatpush.msra.mxu0 %v528_v13  ;;  %645 = vmatpush.msra.mxu1 %v528_v13 }
  0x32   : > { %2639 = vmatmul.msk.f32.gmra.mxu2 %vm705_vm0, %v524_v16 }
  0x33   : > { %564 = vmatpush.msra.mxu0 %v527_v14  ;;  %646 = vmatpush.msra.mxu1 %v527_v14 }
  0x35   : > { %565 = vmatpush.msra.mxu0 %v526_v15  ;;  %647 = vmatpush.msra.mxu1 %v526_v15 }
  0x37   : > { %566 = vmatpush.msra.mxu0 %v525_v17  ;;  %648 = vmatpush.msra.mxu1 %v525_v17 }
  0x39   : > { %567 = vmatpush.msra.mxu0 %v524_v16  ;;  %649 = vmatpush.msra.mxu1 %v524_v16 }
  0x3a   : > { %2640 = vmatmul.msk.f32.gmra.mxu2 %vm705_vm0, %v525_v17 }
  0x3b   : > { %568 = vmatpush.msra.mxu0 %v523_v11  ;;  %650 = vmatpush.msra.mxu1 %v523_v11 }
  0x3d   : > { %569 = vmatpush.msra.mxu0 %v522_v6  ;;  %651 = vmatpush.msra.mxu1 %v522_v6 }
  0x3e   : > { %570 = vmatmul.f32.vlgmr.msra.gmra.mxu0 %v538_v18  ;;  %652 = vmatmul.f32.vlgmr.msra.gmra.mxu1 %v2621_v19 }
  0x42   : > { %2641 = vmatmul.msk.f32.gmra.mxu2 %vm705_vm0, %v526_v15 }
  0x46   : > { %573 = vmatmul.f32.gmra.mxu0 %v539_v20  ;;  %655 = vmatmul.f32.gmra.mxu1 %v2622_v21 }
  0x4a   : > { %2642 = vmatmul.msk.f32.gmra.mxu2 %vm705_vm0, %v527_v14 }
  0x4e   : > { %576 = vmatmul.f32.gmra.mxu0 %v540_v22  ;;  %658 = vmatmul.f32.gmra.mxu1 %v2623_v23 }
  0x52   : > { %2643 = vmatmul.msk.f32.gmra.mxu2 %vm705_vm0, %v528_v13 }
  0x56   : > { %579 = vmatmul.f32.gmra.mxu0 %v541_v24  ;;  %661 = vmatmul.f32.gmra.mxu1 %v2624_v25 }
  0x5a   : > { %2644 = vmatmul.msk.f32.gmra.mxu2 %vm705_vm0, %v529_v12 }
  0x5e   : > { %582 = vmatmul.f32.gmra.mxu0 %v542_v26  ;;  %664 = vmatmul.f32.gmra.mxu1 %v2625_v27 }
  0x62   : > { %2645 = vmatmul.msk.f32.gmra.mxu2 %vm705_vm0, %v530_v10 }
  0x66   : > { %585 = vmatmul.f32.gmra.mxu0 %v543_v28  ;;  %667 = vmatmul.f32.gmra.mxu1 %v2626_v29 }
  0x6a   : > { %2646 = vmatmul.msk.f32.gmra.mxu2 %vm705_vm0, %v3118_v9 }
  0x6e   : > { %588 = vmatmul.f32.gmra.mxu0 %v544_v30  ;;  %670 = vmatmul.f32.gmra.mxu1 %v2627_v31 }
  0x72   : > { %2647 = vmatmul.msk.f32.gmra.mxu2 %vm705_vm0, %v3113_v8 }
  0x76   : > { %591 = vmatmul.f32.gmra.mxu0 %v545_v32  ;;  %673 = vmatmul.f32.gmra.mxu1 %v2628_v33 }
  0x7a   : > { %2648 = vmatmul.msk.f32.gmra.mxu2 %vm705_vm0, %v3107_v7 }
  0x7e   : > { %594 = vmatmul.f32.gmra.mxu0 %v546_v34  ;;  %676 = vmatmul.f32.gmra.mxu1 %v2629_v35 }
  0x82   : > { %2649 = vmatmul.msk.f32.gmra.mxu2 %vm705_vm0, %v3101_v5 }
  0x86   : > { %597 = vmatmul.f32.gmra.mxu0 %v547_v37  ;;  %679 = vmatmul.f32.gmra.mxu1 %v2630_v38 }
  0x8a   : > { %2650 = vmatmul.msk.f32.gmra.mxu2 %vm705_vm0, %v3096_v4 }
  0x8e   : > { %600 = vmatmul.f32.gmra.mxu0 %v548_v39  ;;  %682 = vmatmul.f32.gmra.mxu1 %v2631_v40 }
  0x92   : > { %2651 = vmatmul.msk.f32.gmra.mxu2 %vm705_vm0, %v3091_v3 }
  0x96   : > { %603 = vmatmul.f32.gmra.mxu0 %v549_v41  ;;  %685 = vmatmul.f32.gmra.mxu1 %v2632_v42 }
  0x9a   : > { %2652 = vmatmul.msk.f32.gmra.mxu2 %vm705_vm0, %v3088_v2 }
  0x9e   : > { %606 = vmatmul.f32.gmra.mxu0 %v550_v45  ;;  %688 = vmatmul.f32.gmra.mxu1 %v2633_v46 }
  0xa5   : > { %v3250_v50 = vpop.f32.mrf.mxu2 }
  0xa6   : > { %609 = vmatmul.f32.gmra.mxu0 %v551_v48  ;;  %691 = vmatmul.f32.gmra.mxu1 %v2634_v49 }
  0xad   : > { %v3258_v53 = vpop.f32.mrf.mxu2 }
  0xae   : > { %612 = vmatmul.f32.gmra.mxu0 %v552_v51  ;;  %694 = vmatmul.f32.gmra.mxu1 %v2635_v52 }
  0xb5   : > { %v3266_v56 = vpop.f32.mrf.mxu2 }
  0xb6   : > { %615 = vmatmul.f32.gmra.mxu0 %v553_v54  ;;  %697 = vmatmul.f32.gmra.mxu1 %v2636_v55 }
  0xbb   : > { %v571_v57 = vpop.f32.mrf.mxu0  ;;  %v653_v58 = vpop.f32.mrf.mxu1 }
  0xbc   : > { %2653 = vmatmul.msk.f32.vlgmr.msra.gmra.mxu3 %vm705_vm0, %v571_v57  ;;  %2669 = vmatmul.msk.f32.vlgmr.msrb.gmra.mxu2 %vm705_vm0, %v653_v58 }
  0xbd   : > { %v3270_v59 = vpop.f32.mrf.mxu2 }
  0xc3   : > { %v574_v60 = vpop.f32.mrf.mxu0  ;;  %v656_v61 = vpop.f32.mrf.mxu1 }
  0xc4   : > { %2654 = vmatmul.msk.f32.gmra.mxu3 %vm705_vm0, %v574_v60  ;;  %2670 = vmatmul.msk.f32.gmra.mxu2 %vm705_vm0, %v656_v61 }
  0xc5   : > { %v3274_v62 = vpop.f32.mrf.mxu2 }
  0xcb   : > { %v577_v63 = vpop.f32.mrf.mxu0  ;;  %v659_v0 = vpop.f32.mrf.mxu1 }
  0xcc   : > { %2655 = vmatmul.msk.f32.gmra.mxu3 %vm705_vm0, %v577_v63  ;;  %2671 = vmatmul.msk.f32.gmra.mxu2 %vm705_vm0, %v659_v0 }
  0xcd   : > { %v3278_v1 = vpop.f32.mrf.mxu2 }
  0xd3   : > { %v580_v2 = vpop.f32.mrf.mxu0  ;;  %v662_v3 = vpop.f32.mrf.mxu1 }
  0xd4   : > { %2656 = vmatmul.msk.f32.gmra.mxu3 %vm705_vm0, %v580_v2  ;;  %2672 = vmatmul.msk.f32.gmra.mxu2 %vm705_vm0, %v662_v3 }
  0xd5   : > { %v3282_v4 = vpop.f32.mrf.mxu2 }
  0xdb   : > { %v583_v5 = vpop.f32.mrf.mxu0  ;;  %v665_v6 = vpop.f32.mrf.mxu1 }
  0xdc   : > { %2657 = vmatmul.msk.f32.gmra.mxu3 %vm705_vm0, %v583_v5  ;;  %2673 = vmatmul.msk.f32.gmra.mxu2 %vm705_vm0, %v665_v6 }
  0xdd   : > { %v3288_v9 = vpop.f32.mrf.mxu2 }
  0xe3   : > { %v586_v7 = vpop.f32.mrf.mxu0  ;;  %v668_v8 = vpop.f32.mrf.mxu1 }
  0xe4   : > { %2658 = vmatmul.msk.f32.gmra.mxu3 %vm705_vm0, %v586_v7  ;;  %2674 = vmatmul.msk.f32.gmra.mxu2 %vm705_vm0, %v668_v8 }
  0xe5   : > { %v3292_v12 = vpop.f32.mrf.mxu2 }
  0xeb   : > { %v589_v10 = vpop.f32.mrf.mxu0  ;;  %v671_v11 = vpop.f32.mrf.mxu1 }
  0xec   : > { %2659 = vmatmul.msk.f32.gmra.mxu3 %vm705_vm0, %v589_v10  ;;  %2675 = vmatmul.msk.f32.gmra.mxu2 %vm705_vm0, %v671_v11 }
  0xed   : > { %v3296_v15 = vpop.f32.mrf.mxu2 }
  0xf3   : > { %v592_v13 = vpop.f32.mrf.mxu0  ;;  %v674_v14 = vpop.f32.mrf.mxu1 }
  0xf4   : > { %2660 = vmatmul.msk.f32.gmra.mxu3 %vm705_vm0, %v592_v13  ;;  %2676 = vmatmul.msk.f32.gmra.mxu2 %vm705_vm0, %v674_v14 }
  0xf5   : > { %v3300_v18 = vpop.f32.mrf.mxu2 }
  0xfb   : > { %v595_v16 = vpop.f32.mrf.mxu0  ;;  %v677_v17 = vpop.f32.mrf.mxu1 }
  0xfc   : > { %2661 = vmatmul.msk.f32.gmra.mxu3 %vm705_vm0, %v595_v16  ;;  %2677 = vmatmul.msk.f32.gmra.mxu2 %vm705_vm0, %v677_v17 }
  0xfd   : > { %v3306_v23 = vpop.f32.mrf.mxu2 }
 0x103   : > { %v598_v19 = vpop.f32.mrf.mxu0  ;;  %v680_v20 = vpop.f32.mrf.mxu1 }
 0x104   : > { %2662 = vmatmul.msk.f32.gmra.mxu3 %vm705_vm0, %v598_v19  ;;  %2678 = vmatmul.msk.f32.gmra.mxu2 %vm705_vm0, %v680_v20 }
 0x105   : > { %v807_v26 = vpop.f32.mrf.mxu2 }
 0x10b   : > { %v601_v21 = vpop.f32.mrf.mxu0  ;;  %v683_v22 = vpop.f32.mrf.mxu1 }
 0x10c   : > { %2663 = vmatmul.msk.f32.gmra.mxu3 %vm705_vm0, %v601_v21  ;;  %2679 = vmatmul.msk.f32.gmra.mxu2 %vm705_vm0, %v683_v22  ;;  %v3345_v22 = vld [vmem:[%s4201_s15] ss:$0 sm:$0xff] }
 0x10d   : > { %v810_v29 = vpop.f32.mrf.mxu2 }
 0x113   : > { %v604_v24 = vpop.f32.mrf.mxu0  ;;  %v686_v25 = vpop.f32.mrf.mxu1 }
 0x114   : > { %2664 = vmatmul.msk.f32.gmra.mxu3 %vm705_vm0, %v604_v24  ;;  %2680 = vmatmul.msk.f32.gmra.mxu2 %vm705_vm0, %v686_v25 }
 0x115   : > { %v813_v32 = vpop.f32.mrf.mxu2 }
 0x11b   : > { %v607_v27 = vpop.f32.mrf.mxu0  ;;  %v689_v28 = vpop.f32.mrf.mxu1 }
 0x11c   : > { %2665 = vmatmul.msk.f32.gmra.mxu3 %vm705_vm0, %v607_v27  ;;  %2681 = vmatmul.msk.f32.gmra.mxu2 %vm705_vm0, %v689_v28 }
 0x11d   : > { %v816_v37 = vpop.f32.mrf.mxu2 }
 0x123   : > { %v610_v30 = vpop.f32.mrf.mxu0  ;;  %v692_v31 = vpop.f32.mrf.mxu1 }
 0x124   : > { %2666 = vmatmul.msk.f32.gmra.mxu3 %vm705_vm0, %v610_v30  ;;  %2682 = vmatmul.msk.f32.gmra.mxu2 %vm705_vm0, %v692_v31 }
 0x12b   : > { %v613_v33 = vpop.f32.mrf.mxu0  ;;  %v695_v34 = vpop.f32.mrf.mxu1 }
 0x12c   : > { %2667 = vmatmul.msk.f32.gmra.mxu3 %vm705_vm0, %v613_v33  ;;  %2683 = vmatmul.msk.f32.gmra.mxu2 %vm705_vm0, %v695_v34 }
 0x133   : > { %v616_v35 = vpop.f32.mrf.mxu0  ;;  %v698_v36 = vpop.f32.mrf.mxu1 }
 0x134   : > { %2668 = vmatmul.msk.f32.gmra.mxu3 %vm705_vm0, %v616_v35  ;;  %2684 = vmatmul.msk.f32.gmra.mxu2 %vm705_vm0, %v698_v36 }
 0x13f   : > { %v3318_v38 = vpop.f32.mrf.mxu3  ;;  %v3320_v39 = vpop.f32.mrf.mxu2 }
 0x147   : > { %v3322_v40 = vpop.f32.mrf.mxu3  ;;  %v3324_v41 = vpop.f32.mrf.mxu2 }
 0x14f   : > { %v3326_v42 = vpop.f32.mrf.mxu3  ;;  %v3328_v43 = vpop.f32.mrf.mxu2 }
 0x157   : > { %v3330_v44 = vpop.f32.mrf.mxu3  ;;  %v3332_v45 = vpop.f32.mrf.mxu2 }
 0x15f   : > { %v3334_v46 = vpop.f32.mrf.mxu3  ;;  %v3336_v47 = vpop.f32.mrf.mxu2 }
 0x167   : > { %v899_v48 = vpop.f32.mrf.mxu3  ;;  %v3338_v49 = vpop.f32.mrf.mxu2 }
 0x16f   : > { %v902_v51 = vpop.f32.mrf.mxu3  ;;  %v3340_v52 = vpop.f32.mrf.mxu2 }
 0x177   : > { %v905_v54 = vpop.f32.mrf.mxu3  ;;  %v1020_v55 = vpop.f32.mrf.mxu2 }
 0x17f   : > { %v908_v57 = vpop.f32.mrf.mxu3  ;;  %v1023_v58 = vpop.f32.mrf.mxu2 }
 0x180   : > { %v909_v35 = vadd.f32 %v908_v57, %v3292_v12 }
 0x187   : > { %v911_v60 = vpop.f32.mrf.mxu3  ;;  %v1026_v61 = vpop.f32.mrf.mxu2 }
 0x18f   : > { %v914_v63 = vpop.f32.mrf.mxu3  ;;  %v1029_v0 = vpop.f32.mrf.mxu2 }
 0x190   : > { %v915_v28 = vadd.f32 %v914_v63, %v3300_v18  ;;  %v906_v18 = vadd.f32 %v905_v54, %v3288_v9 }
 0x192   : > { %v1057_v36 = vadd.f32 %v1029_v0, %v915_v28  ;;  %v900_v0 = vadd.f32 %v899_v48, %v3278_v1  ;;  %v894_v1 = vadd.f32 %v3330_v44, %v3270_v59  ;;  %v888_v59 = vadd.f32 %v3322_v40, %v3258_v53  ;;  %v2695_v28 = vld [vmem:[%s4190_s4 + $0x90] sm:$0xff] }
 0x194   : > { %v1075_v12 = vadd.f32 %v3345_v22, %v1057_v36  ;;  %v1052_v48 = vadd.f32 %v3338_v49, %v900_v0  ;;  %v1050_v44 = vadd.f32 %v3332_v45, %v894_v1  ;;  %v1048_v53 = vadd.f32 %v3324_v41, %v888_v59  ;;  %v1293_v36 = vld [vmem:[%s4220_s3 + $0x178] sm:$0xff]  ;;  %v1290_v0 = vld [vmem:[%s4220_s3 + $0x160] sm:$0xff]  ;;  %v1255_v1 = vld [vmem:[%s4220_s3 + $0x48] sm:$0xff] }
 0x195   : > { %v1268_v59 = vld [vmem:[%s4220_s3 + $0xb0] sm:$0xff] }
 0x196   : > { %v1070_v49 = vadd.f32 %v3345_v22, %v1052_v48  ;;  %v1068_v40 = vadd.f32 %v3345_v22, %v1050_v44  ;;  %v1288_v48 = vld [vmem:[%s4220_s3 + $0x150] sm:$0xff] }
 0x197   : > { %v917_v2 = vpop.f32.mrf.mxu3  ;;  %v1032_v3 = vpop.f32.mrf.mxu2  ;;  %v1103_v44 = vld [vmem:[%s4190_s4 + $0x30] sm:$0xff] }
 0x198   : > { %v918_v24 = vadd.f32 %v917_v2, %v3306_v23  ;;  %v1086_v45 = vmax.f32 %v1070_v49, 0.0  ;;  %v1285_v49 = vld [vmem:[%s4220_s3 + $0x138] sm:$0xff] }
 0x19f   : > { %v920_v5 = vpop.f32.mrf.mxu3  ;;  %v1035_v6 = vpop.f32.mrf.mxu2 }
 0x1a0   : > { %v921_v19 = vadd.f32 %v920_v5, %v807_v26  ;;  %v912_v26 = vadd.f32 %v911_v60, %v3296_v15  ;;  %v903_v60 = vadd.f32 %v902_v51, %v3282_v4  ;;  %v1054_v5 = vadd.f32 %v1020_v55, %v906_v18  ;;  %v1292_v18 = vld [vmem:[%s4220_s3 + $0x170] sm:$0xff] }
 0x1a2   : > { %v1059_v30 = vadd.f32 %v1035_v6, %v921_v19  ;;  %v1056_v63 = vadd.f32 %v1026_v61, %v912_v26  ;;  %v897_v61 = vadd.f32 %v3334_v46, %v3274_v62  ;;  %v1053_v4 = vadd.f32 %v3340_v52, %v903_v60  ;;  %v2685_v19 = vld [vmem:[%s4190_s4 + $0x40] sm:$0xff]  ;;  %v1261_v26 = vld [vmem:[%s4220_s3 + $0x78] sm:$0xff] }
 0x1a3   : > { %v1072_v55 = vadd.f32 %v3345_v22, %v1054_v5  ;;  %v891_v62 = vadd.f32 %v3326_v42, %v3266_v56  ;;  %v885_v56 = vadd.f32 %v3318_v38, %v3250_v50  ;;  %v1274_v60 = vld [vmem:[%s4220_s3 + $0xe0] sm:$0xff]  ;;  %v1256_v5 = vld [vmem:[%s4220_s3 + $0x50] sm:$0xff] }
 0x1a4   : > { %v1077_v23 = vadd.f32 %v3345_v22, %v1059_v30  ;;  %v1074_v9 = vadd.f32 %v3345_v22, %v1056_v63  ;;  %v1051_v46 = vadd.f32 %v3336_v47, %v897_v61  ;;  %v1071_v52 = vadd.f32 %v3345_v22, %v1053_v4  ;;  %v1100_v30 = vld [vmem:[%s4190_s4 + $0x18] sm:$0xff]  ;;  %v2689_v63 = vld [vmem:[%s4190_s4 + $0x60] sm:$0xff]  ;;  %v1102_v61 = vld [vmem:[%s4190_s4 + $0x28] sm:$0xff] }
 0x1a5   : > { %v1049_v42 = vadd.f32 %v3328_v43, %v891_v62  ;;  %v1066_v43 = vadd.f32 %v3345_v22, %v1048_v53  ;;  %v1271_v4 = vld [vmem:[%s4220_s3 + $0xc8] sm:$0xff] }
 0x1a6   : > { %v1093_v57 = vmax.f32 %v1077_v23, 0.0  ;;  %v1090_v6 = vmax.f32 %v1074_v9, 0.0  ;;  %v1069_v47 = vadd.f32 %v3345_v22, %v1051_v46  ;;  %v1101_v23 = vld [vmem:[%s4190_s4 + $0x20] sm:$0xff]  ;;  %v1272_v9 = vld [vmem:[%s4220_s3 + $0xd0] sm:$0xff]  ;;  %v1287_v62 = vld [vmem:[%s4220_s3 + $0x148] sm:$0xff] }
 0x1a7   : > { %v923_v7 = vpop.f32.mrf.mxu3  ;;  %v1038_v8 = vpop.f32.mrf.mxu2  ;;  %v1067_v50 = vadd.f32 %v3345_v22, %v1049_v42  ;;  %v1269_v46 = vld [vmem:[%s4220_s3 + $0xb8] sm:$0xff]  ;;  %v1252_v42 = vld [vmem:[%s4220_s3 + $0x30] sm:$0xff]  ;;  %v1251_v53 = vld [vmem:[%s4220_s3 + $0x28] sm:$0xff] }
 0x1a8   : > { %v924_v14 = vadd.f32 %v923_v7, %v810_v29  ;;  %v1085_v38 = vmax.f32 %v1069_v47, 0.0  ;;  %v1267_v47 = vld [vmem:[%s4220_s3 + $0xa8] sm:$0xff] }
 0x1aa   : > { %v1060_v25 = vadd.f32 %v1038_v8, %v924_v14  ;;  %v1088_v8 = vmax.f32 %v1072_v55, 0.0  ;;  %v1083_v14 = vmax.f32 %v1067_v50, 0.0  ;;  %v1270_v55 = vld [vmem:[%s4220_s3 + $0xc0] sm:$0xff]  ;;  %v2700_v50 = vld [vmem:[%s4190_s4 + $0xb8] sm:$0xff] }
 0x1ac   : > { %v1078_v33 = vadd.f32 %v3345_v22, %v1060_v25  ;;  %v1099_v25 = vld [vmem:[%s4190_s4 + $0x10] sm:$0xff] }
 0x1ae   : > { %v1094_v15 = vmax.f32 %v1078_v33, 0.0  ;;  %v1259_v33 = vld [vmem:[%s4220_s3 + $0x68] sm:$0xff] }
 0x1af   : > { %v926_v10 = vpop.f32.mrf.mxu3  ;;  %v1041_v11 = vpop.f32.mrf.mxu2 }
 0x1b0   : > { %v927_v13 = vadd.f32 %v926_v10, %v813_v32  ;;  %v1058_v32 = vadd.f32 %v1032_v3, %v918_v24  ;;  %v1055_v3 = vadd.f32 %v1023_v58, %v909_v35  ;;  %v1091_v58 = vmax.f32 %v1075_v12, 0.0  ;;  %v2694_v24 = vld [vmem:[%s4190_s4 + $0x88] sm:$0xff]  ;;  %v1276_v35 = vld [vmem:[%s4220_s3 + $0xf0] sm:$0xff]  ;;  %v1257_v12 = vld [vmem:[%s4220_s3 + $0x58] sm:$0xff] }
 0x1b1   : > { %v1087_v10 = vmax.f32 %v1071_v52, 0.0  ;;  %v1253_v52 = vld [vmem:[%s4220_s3 + $0x38] sm:$0xff] }
 0x1b2   : > { %v1061_v20 = vadd.f32 %v1041_v11, %v927_v13  ;;  %v1076_v2 = vadd.f32 %v3345_v22, %v1058_v32  ;;  %v1073_v51 = vadd.f32 %v3345_v22, %v1055_v3  ;;  %v1047_v11 = vadd.f32 %v3320_v39, %v885_v56  ;;  %v1260_v32 = vld [vmem:[%s4220_s3 + $0x70] sm:$0xff]  ;;  %v1291_v3 = vld [vmem:[%s4220_s3 + $0x168] sm:$0xff] }
 0x1b3   : > { %v1084_v13 = vmax.f32 %v1068_v40, 0.0  ;;  %v1082_v39 = vmax.f32 %v1066_v43, 0.0  ;;  %v2699_v56 = vld [vmem:[%s4190_s4 + $0xb0] sm:$0xff]  ;;  %v1250_v40 = vld [vmem:[%s4220_s3 + $0x20] sm:$0xff] }
 0x1b4   : > { %v1079_v31 = vadd.f32 %v3345_v22, %v1061_v20  ;;  %v1092_v54 = vmax.f32 %v1076_v2, 0.0  ;;  %v1089_v7 = vmax.f32 %v1073_v51, 0.0  ;;  %v1065_v41 = vadd.f32 %v3345_v22, %v1047_v11  ;;  %v2693_v20 = vld [vmem:[%s4190_s4 + $0x80] sm:$0xff]  ;;  %v2690_v51 = vld [vmem:[%s4190_s4 + $0x68] sm:$0xff]  ;;  %v2692_v11 = vld [vmem:[%s4190_s4 + $0x78] sm:$0xff] }
 0x1b5   : > { %v2697_v2 = vld [vmem:[%s4190_s4 + $0xa0] sm:$0xff]  ;;  %v1248_v43 = vld [vmem:[%s4220_s3 + $0x10] sm:$0xff] }
 0x1b7   : > { %v929_v16 = vpop.f32.mrf.mxu3  ;;  %v1044_v17 = vpop.f32.mrf.mxu2 }
 0x1b8   : > { %v930_v21 = vadd.f32 %v929_v16, %v816_v37  ;;  %v1095_v37 = vmax.f32 %v1079_v31, 0.0  ;;  %v1081_v16 = vmax.f32 %v1065_v41, 0.0  ;;  %v2688_v31 = vld [vmem:[%s4190_s4 + $0x58] sm:$0xff] }
 0x1b9   : > { %v1434_v41 = vld [vmem:[%s4191_s5 + $0x78] sm:$0xff] }
 0x1ba   : > { %v1062_v27 = vadd.f32 %v1044_v17, %v930_v21  ;;  %v1097_v17 = vld [vmem:[%s4190_s4] sm:$0xff]  ;;  %v1098_v21 = vld [vmem:[%s4190_s4 + $0x8] sm:$0xff]  ;;  %1437 = vmatpush.msra.mxu2 %v1434_v41 }
 0x1bc   : > { %v1080_v29 = vadd.f32 %v3345_v22, %v1062_v27  ;;  %v2686_v22 = vld [vmem:[%s4190_s4 + $0x48] sm:$0xff]  ;;  %v2687_v27 = vld [vmem:[%s4190_s4 + $0x50] sm:$0xff] }
 0x1be   : > { %v1096_v34 = vmax.f32 %v1080_v29, 0.0  ;;  %v2696_v29 = vld [vmem:[%s4190_s4 + $0x98] sm:$0xff] }
 0x1c0   : > { %1105 = vmatpush.msrb.mxu3 %v1096_v34  ;;  %1155 = vmatpush.msrb.mxu0 %v1096_v34 }
 0x1c1   : > { %1205 = vmatpush.msrb.mxu1 %v1096_v34  ;;  %v1277_v34 = vld [vmem:[%s4220_s3 + $0xf8] sm:$0xff] }
 0x1c2   : > { %1106 = vmatpush.msrb.mxu3 %v1095_v37  ;;  %1156 = vmatpush.msrb.mxu0 %v1095_v37 }
 0x1c3   : > { %1206 = vmatpush.msrb.mxu1 %v1095_v37  ;;  %v1275_v37 = vld [vmem:[%s4220_s3 + $0xe8] sm:$0xff] }
 0x1c4   : > { %1107 = vmatpush.msrb.mxu3 %v1094_v15  ;;  %1157 = vmatpush.msrb.mxu0 %v1094_v15 }
 0x1c5   : > { %1207 = vmatpush.msrb.mxu1 %v1094_v15  ;;  %v1258_v15 = vld [vmem:[%s4220_s3 + $0x60] sm:$0xff] }
 0x1c6   : > { %1108 = vmatpush.msrb.mxu3 %v1093_v57  ;;  %1158 = vmatpush.msrb.mxu0 %v1093_v57 }
 0x1c7   : > { %1208 = vmatpush.msrb.mxu1 %v1093_v57  ;;  %v1273_v57 = vld [vmem:[%s4220_s3 + $0xd8] sm:$0xff] }
 0x1c8   : > { %1109 = vmatpush.msrb.mxu3 %v1092_v54  ;;  %1159 = vmatpush.msrb.mxu0 %v1092_v54 }
 0x1c9   : > { %1209 = vmatpush.msrb.mxu1 %v1092_v54  ;;  %v1289_v54 = vld [vmem:[%s4220_s3 + $0x158] sm:$0xff] }
 0x1ca   : > { %1110 = vmatpush.msrb.mxu3 %v1091_v58  ;;  %1160 = vmatpush.msrb.mxu0 %v1091_v58 }
 0x1cb   : > { %1210 = vmatpush.msrb.mxu1 %v1091_v58  ;;  %v2698_v58 = vld [vmem:[%s4190_s4 + $0xa8] sm:$0xff] }
 0x1cc   : > { %1111 = vmatpush.msrb.mxu3 %v1090_v6  ;;  %1161 = vmatpush.msrb.mxu0 %v1090_v6 }
 0x1cd   : > { %1211 = vmatpush.msrb.mxu1 %v1090_v6  ;;  %v1254_v6 = vld [vmem:[%s4220_s3 + $0x40] sm:$0xff] }
 0x1ce   : > { %1112 = vmatpush.msrb.mxu3 %v1089_v7  ;;  %1162 = vmatpush.msrb.mxu0 %v1089_v7 }
 0x1cf   : > { %1212 = vmatpush.msrb.mxu1 %v1089_v7  ;;  %v1286_v7 = vld [vmem:[%s4220_s3 + $0x140] sm:$0xff] }
 0x1d0   : > { %1113 = vmatpush.msrb.mxu3 %v1088_v8  ;;  %1163 = vmatpush.msrb.mxu0 %v1088_v8 }
 0x1d1   : > { %1213 = vmatpush.msrb.mxu1 %v1088_v8  ;;  %v2691_v8 = vld [vmem:[%s4190_s4 + $0x70] sm:$0xff] }
 0x1d2   : > { %1114 = vmatpush.msrb.mxu3 %v1087_v10  ;;  %1164 = vmatpush.msrb.mxu0 %v1087_v10 }
 0x1d3   : > { %1214 = vmatpush.msrb.mxu1 %v1087_v10  ;;  %v1284_v10 = vld [vmem:[%s4220_s3 + $0x130] sm:$0xff] }
 0x1d4   : > { %1115 = vmatpush.msrb.mxu3 %v1086_v45  ;;  %1165 = vmatpush.msrb.mxu0 %v1086_v45 }
 0x1d5   : > { %1215 = vmatpush.msrb.mxu1 %v1086_v45  ;;  %v1104_v45 = vld [vmem:[%s4190_s4 + $0x38] sm:$0xff] }
 0x1d6   : > { %1116 = vmatpush.msrb.mxu3 %v1085_v38  ;;  %1166 = vmatpush.msrb.mxu0 %v1085_v38 }
 0x1d7   : > { %1216 = vmatpush.msrb.mxu1 %v1085_v38  ;;  %v1249_v38 = vld [vmem:[%s4220_s3 + $0x18] sm:$0xff] }
 0x1d8   : > { %1117 = vmatpush.msrb.mxu3 %v1084_v13  ;;  %1167 = vmatpush.msrb.mxu0 %v1084_v13 }
 0x1d9   : > { %1217 = vmatpush.msrb.mxu1 %v1084_v13  ;;  %v1247_v13 = vld [vmem:[%s4220_s3 + $0x8] sm:$0xff] }
 0x1da   : > { %1118 = vmatpush.msrb.mxu3 %v1083_v14  ;;  %1168 = vmatpush.msrb.mxu0 %v1083_v14 }
 0x1db   : > { %1218 = vmatpush.msrb.mxu1 %v1083_v14  ;;  %v1433_v14 = vld [vmem:[%s4191_s5 + $0x70] sm:$0xff] }
 0x1dc   : > { %1119 = vmatpush.msrb.mxu3 %v1082_v39  ;;  %1169 = vmatpush.msrb.mxu0 %v1082_v39 }
 0x1dd   : > { %1219 = vmatpush.msrb.mxu1 %v1082_v39  ;;  %1438 = vmatpush.msra.mxu2 %v1433_v14  ;;  %v1432_v39 = vld [vmem:[%s4191_s5 + $0x68] sm:$0xff] }
 0x1de   : > { %1120 = vmatpush.msrb.mxu3 %v1081_v16  ;;  %1170 = vmatpush.msrb.mxu0 %v1081_v16 }
 0x1df   : > { %1220 = vmatpush.msrb.mxu1 %v1081_v16  ;;  %1121 = vmatmul.f32.vlgmr.msrb.gmra.mxu3 %v1097_v17  ;;  %v1431_v16 = vld [vmem:[%s4191_s5 + $0x60] sm:$0xff]  ;;  %v1430_v17 = vld [vmem:[%s4191_s5 + $0x58] sm:$0xff] }
 0x1e0   : > { %1171 = vmatmul.f32.vlgmr.msrb.gmra.mxu0 %v2685_v19  ;;  %1221 = vmatmul.f32.vlgmr.msrb.gmra.mxu1 %v2693_v20  ;;  %v1429_v19 = vld [vmem:[%s4191_s5 + $0x50] sm:$0xff]  ;;  %v1428_v20 = vld [vmem:[%s4191_s5 + $0x48] sm:$0xff] }
 0x1e1   : > { %1296 = vmatpush.msra.mxu3 %v1261_v26  ;;  %1337 = vmatpush.msra.mxu0 %v1277_v34  ;;  %v1264_v26 = vld [vmem:[%s4220_s3 + $0x90] sm:$0xff]  ;;  %v1422_v34 = vld [vmem:[%s4191_s5 + $0x18] sm:$0xff] }
 0x1e2   : > { %1378 = vmatpush.msra.mxu1 %v1293_v36  ;;  %1439 = vmatpush.msra.mxu2 %v1432_v39  ;;  %v1280_v36 = vld [vmem:[%s4220_s3 + $0x110] sm:$0xff] }
 0x1e3   : > { %1297 = vmatpush.msra.mxu3 %v1260_v32  ;;  %1338 = vmatpush.msra.mxu0 %v1276_v35  ;;  %v1281_v32 = vld [vmem:[%s4220_s3 + $0x118] sm:$0xff]  ;;  %v1263_v35 = vld [vmem:[%s4220_s3 + $0x88] sm:$0xff] }
 0x1e4   : > { %1379 = vmatpush.msra.mxu1 %v1292_v18  ;;  %1440 = vmatpush.msra.mxu2 %v1431_v16  ;;  %v1262_v18 = vld [vmem:[%s4220_s3 + $0x80] sm:$0xff] }
 0x1e5   : > { %1298 = vmatpush.msra.mxu3 %v1259_v33  ;;  %1339 = vmatpush.msra.mxu0 %v1275_v37  ;;  %v1423_v33 = vld [vmem:[%s4191_s5 + $0x20] sm:$0xff]  ;;  %v1420_v37 = vld [vmem:[%s4191_s5 + $0x8] sm:$0xff] }
 0x1e6   : > { %1380 = vmatpush.msra.mxu1 %v1291_v3  ;;  %1441 = vmatpush.msra.mxu2 %v1430_v17 }
 0x1e7   : > { %1124 = vmatmul.f32.gmra.mxu3 %v1098_v21  ;;  %1340 = vmatpush.msra.mxu0 %v1274_v60  ;;  %v1427_v21 = vld [vmem:[%s4191_s5 + $0x40] sm:$0xff] }
 0x1e8   : > { %1174 = vmatmul.f32.gmra.mxu0 %v2686_v22  ;;  %1224 = vmatmul.f32.gmra.mxu1 %v2694_v24  ;;  %v1426_v22 = vld [vmem:[%s4191_s5 + $0x38] sm:$0xff]  ;;  %v1425_v24 = vld [vmem:[%s4191_s5 + $0x30] sm:$0xff] }
 0x1e9   : > { %1299 = vmatpush.msra.mxu3 %v1258_v15  ;;  %1341 = vmatpush.msra.mxu0 %v1273_v57  ;;  %v1419_v15 = vld [vmem:[%s4191_s5] sm:$0xff] }
 0x1ea   : > { %1381 = vmatpush.msra.mxu1 %v1290_v0  ;;  %1442 = vmatpush.msra.mxu2 %v1429_v19 }
 0x1eb   : > { %1300 = vmatpush.msra.mxu3 %v1257_v12  ;;  %1342 = vmatpush.msra.mxu0 %v1272_v9 }
 0x1ec   : > { %1382 = vmatpush.msra.mxu1 %v1289_v54  ;;  %1443 = vmatpush.msra.mxu2 %v1428_v20 }
 0x1ed   : > { %1301 = vmatpush.msra.mxu3 %v1256_v5  ;;  %1343 = vmatpush.msra.mxu0 %v1271_v4 }
 0x1ee   : > { %1383 = vmatpush.msra.mxu1 %v1288_v48  ;;  %1444 = vmatpush.msra.mxu2 %v1427_v21 }
 0x1ef   : > { %1127 = vmatmul.f32.gmra.mxu3 %v1099_v25  ;;  %1344 = vmatpush.msra.mxu0 %v1270_v55  ;;  %v1424_v25 = vld [vmem:[%s4191_s5 + $0x28] sm:$0xff] }
 0x1f0   : > { %1177 = vmatmul.f32.gmra.mxu0 %v2687_v27  ;;  %1227 = vmatmul.f32.gmra.mxu1 %v2695_v28  ;;  %v1246_v27 = vld [vmem:[%s4220_s3] sm:$0xff] }
 0x1f1   : > { %1302 = vmatpush.msra.mxu3 %v1255_v1  ;;  %1384 = vmatpush.msra.mxu1 %v1287_v62  ;;  %v1266_v28 = vld [vmem:[%s4220_s3 + $0xa0] sm:$0xff] }
 0x1f2   : > { %1345 = vmatpush.msra.mxu0 %v1269_v46  ;;  %1445 = vmatpush.msra.mxu2 %v1426_v22 }
 0x1f3   : > { %1303 = vmatpush.msra.mxu3 %v1254_v6  ;;  %1385 = vmatpush.msra.mxu1 %v1286_v7 }
 0x1f4   : > { %1346 = vmatpush.msra.mxu0 %v1268_v59  ;;  %1446 = vmatpush.msra.mxu2 %v1425_v24 }
 0x1f5   : > { %1304 = vmatpush.msra.mxu3 %v1253_v52  ;;  %1386 = vmatpush.msra.mxu1 %v1285_v49 }
 0x1f6   : > { %1347 = vmatpush.msra.mxu0 %v1267_v47  ;;  %1447 = vmatpush.msra.mxu2 %v1424_v25  ;;  %v1647_v47 = vld [vmem:[%s4192_s6 + $0x68] sm:$0xff] }
 0x1f7   : > { %1130 = vmatmul.f32.gmra.mxu3 %v1100_v30  ;;  %1387 = vmatpush.msra.mxu1 %v1284_v10  ;;  %v1283_v30 = vld [vmem:[%s4220_s3 + $0x128] sm:$0xff]  ;;  %v1646_v10 = vld [vmem:[%s4192_s6 + $0x60] sm:$0xff] }
 0x1f8   : > { %1180 = vmatmul.f32.gmra.mxu0 %v2688_v31  ;;  %1230 = vmatmul.f32.gmra.mxu1 %v2696_v29  ;;  %v1265_v31 = vld [vmem:[%s4220_s3 + $0x98] sm:$0xff]  ;;  %v1282_v29 = vld [vmem:[%s4220_s3 + $0x120] sm:$0xff] }
 0x1f9   : > { %1305 = vmatpush.msra.mxu3 %v1252_v42  ;;  %1348 = vmatpush.msra.mxu0 %v1266_v28  ;;  %v1648_v42 = vld [vmem:[%s4192_s6 + $0x70] sm:$0xff] }
 0x1fa   : > { %1388 = vmatpush.msra.mxu1 %v1283_v30  ;;  %1448 = vmatpush.msra.mxu2 %v1423_v33 }
 0x1fb   : > { %1306 = vmatpush.msra.mxu3 %v1251_v53  ;;  %1349 = vmatpush.msra.mxu0 %v1265_v31  ;;  %v1645_v53 = vld [vmem:[%s4192_s6 + $0x58] sm:$0xff] }
 0x1fc   : > { %1389 = vmatpush.msra.mxu1 %v1282_v29  ;;  %1449 = vmatpush.msra.mxu2 %v1422_v34 }
 0x1fd   : > { %1307 = vmatpush.msra.mxu3 %v1250_v40  ;;  %1350 = vmatpush.msra.mxu0 %v1264_v26  ;;  %v1644_v40 = vld [vmem:[%s4192_s6 + $0x50] sm:$0xff] }
 0x1fe   : > { %1390 = vmatpush.msra.mxu1 %v1281_v32 }
 0x1ff   : > { %1133 = vmatmul.f32.gmra.mxu3 %v1101_v23  ;;  %v1421_v23 = vld [vmem:[%s4191_s5 + $0x10] sm:$0xff]  ;;  %1351 = vmatpush.msra.mxu0 %v1263_v35 }
 0x200   : > { %1183 = vmatmul.f32.gmra.mxu0 %v2689_v63  ;;  %1233 = vmatmul.f32.gmra.mxu1 %v2697_v2  ;;  %v1279_v63 = vld [vmem:[%s4220_s3 + $0x108] sm:$0xff]  ;;  %v1278_v2 = vld [vmem:[%s4220_s3 + $0x100] sm:$0xff]  ;;  %s2892_s3 = sshra.s32 %s2555_s17, 4  ;;  %s2893_s3 = int_to_ptr.hbm [resolvable:$true] %s2892_s3 }
 0x201   : > { %1308 = vmatpush.msra.mxu3 %v1249_v38  ;;  %1391 = vmatpush.msra.mxu1 %v1280_v36  ;;  %s2894_s25 = scalar_lea.hbm %s2893_s3, 8  ;;  %p2899_p0 = scmp.lt.s32.totalorder %s2893_s3, %s4202_s16 }
 0x202   : > { %1450 = vmatpush.msra.mxu2 %v1421_v23  ;;  %1352 = vmatpush.msra.mxu0 %v1262_v18  ;;  %p2895_p11 = scmp.ne.s32.totalorder %s2893_s3, %s2894_s25  ;;  %p2900_p1 = scmp.lt.s32.totalorder %s2898_s29, %s2894_s25 }
 0x203   : > { %1309 = vmatpush.msra.mxu3 %v1248_v43  ;;  %1392 = vmatpush.msra.mxu1 %v1279_v63  ;;  %v2871_v43 = vld [vmem:[%s4201_s15 + $0x1] ss:$0 sm:$0xff] }
 0x204   : > { %1451 = vmatpush.msra.mxu2 %v1420_v37  ;;  %p2896_p12 = pnand %p2895_p11, %p3065_p5  ;;  %p2901_p2 = por %p2900_p1, %p2899_p0 }
 0x205   : > { %1310 = vmatpush.msra.mxu3 %v1247_v13  ;;  %1393 = vmatpush.msra.mxu1 %v1278_v2 }
 0x206   : > { %1452 = vmatpush.msra.mxu2 %v1419_v15  ;;  %p2897_p13 = pneg %p2896_p12 }
 0x207   : > { %1136 = vmatmul.f32.gmra.mxu3 %v1102_v61 }
 0x208   : > { %1186 = vmatmul.f32.gmra.mxu0 %v2690_v51  ;;  %1236 = vmatmul.f32.gmra.mxu1 %v2698_v58  ;;  %p2902_p3 = pnand %p2901_p2, %p2897_p13 }
 0x209   : > { %1311 = vmatpush.msra.mxu3 %v1246_v27 }
 0x20f   : > { %1139 = vmatmul.f32.gmra.mxu3 %v1103_v44 }
 0x210   : > { %1189 = vmatmul.f32.gmra.mxu0 %v2691_v8  ;;  %1239 = vmatmul.f32.gmra.mxu1 %v2699_v56  ;;  %v1649_v56 = vld [vmem:[%s4192_s6 + $0x78] sm:$0xff] }
 0x211   : > { %1682 = vmatpush.msrb.mxu1 %v1649_v56 }
 0x213   : > { %1683 = vmatpush.msrb.mxu1 %v1648_v42  ;;  %v1486_v42 = vld [vmem:[%s4193_s7] sm:$0xff] }
 0x215   : > { %1684 = vmatpush.msrb.mxu1 %v1647_v47  ;;  %v2709_v47 = vld [vmem:[%s4193_s7 + $0x40] sm:$0xff] }
 0x217   : > { %1142 = vmatmul.f32.gmra.mxu3 %v1104_v45  ;;  %1685 = vmatpush.msrb.mxu1 %v1646_v10  ;;  %v1643_v45 = vld [vmem:[%s4192_s6 + $0x48] sm:$0xff] }
 0x218   : > { %1192 = vmatmul.f32.gmra.mxu0 %v2692_v11  ;;  %1242 = vmatmul.f32.gmra.mxu1 %v2700_v50  ;;  %v1642_v11 = vld [vmem:[%s4192_s6 + $0x40] sm:$0xff]  ;;  %v1487_v10 = vld [vmem:[%s4193_s7 + $0x8] sm:$0xff] }
 0x219   : > { %1686 = vmatpush.msrb.mxu1 %v1645_v53  ;;  %v2710_v53 = vld [vmem:[%s4193_s7 + $0x48] sm:$0xff] }
 0x21b   : > { %1687 = vmatpush.msrb.mxu1 %v1644_v40  ;;  %v1488_v40 = vld [vmem:[%s4193_s7 + $0x10] sm:$0xff] }
 0x21d   : > { %1688 = vmatpush.msrb.mxu1 %v1643_v45  ;;  %v2711_v45 = vld [vmem:[%s4193_s7 + $0x50] sm:$0xff] }
 0x21f   : > { %1689 = vmatpush.msrb.mxu1 %v1642_v11  ;;  %v1489_v11 = vld [vmem:[%s4193_s7 + $0x18] sm:$0xff] }
 0x25d   : > { %v1172_v60 = vpop.f32.mrf.mxu0  ;;  %v1222_v3 = vpop.f32.mrf.mxu1 }
 0x25e   : > { %1353 = vmatmul.f32.vlgmr.msra.gmra.mxu0 %v1172_v60  ;;  %1394 = vmatmul.f32.vlgmr.msra.gmra.mxu1 %v1222_v3 }
 0x25f   : > { %1453 = vmatmul.f32.vlgmr.msra.gmra.mxu2 %v1172_v60 }
 0x262   : > { %v1122_v12 = vpop.f32.mrf.mxu3 }
 0x263   : > { %1312 = vmatmul.f32.vlgmr.msra.gmra.mxu3 %v1122_v12 }
 0x265   : > { %v1175_v57 = vpop.f32.mrf.mxu0  ;;  %v1225_v0 = vpop.f32.mrf.mxu1 }
 0x266   : > { %1356 = vmatmul.f32.gmra.mxu0 %v1175_v57  ;;  %1397 = vmatmul.f32.gmra.mxu1 %v1225_v0 }
 0x267   : > { %1456 = vmatmul.f32.gmra.mxu2 %v1175_v57 }
 0x26a   : > { %v1125_v5 = vpop.f32.mrf.mxu3 }
 0x26b   : > { %1315 = vmatmul.f32.gmra.mxu3 %v1125_v5 }
 0x26d   : > { %v1178_v9 = vpop.f32.mrf.mxu0  ;;  %v1228_v54 = vpop.f32.mrf.mxu1 }
 0x26e   : > { %1359 = vmatmul.f32.gmra.mxu0 %v1178_v9  ;;  %1400 = vmatmul.f32.gmra.mxu1 %v1228_v54 }
 0x26f   : > { %1459 = vmatmul.f32.gmra.mxu2 %v1178_v9 }
 0x272   : > { %v1128_v61 = vpop.f32.mrf.mxu3 }
 0x273   : > { %1318 = vmatmul.f32.gmra.mxu3 %v1128_v61 }
 0x275   : > { %v1181_v4 = vpop.f32.mrf.mxu0  ;;  %v1231_v51 = vpop.f32.mrf.mxu1 }
 0x276   : > { %1362 = vmatmul.f32.gmra.mxu0 %v1181_v4  ;;  %1403 = vmatmul.f32.gmra.mxu1 %v1231_v51 }
 0x277   : > { %1462 = vmatmul.f32.gmra.mxu2 %v1181_v4 }
 0x27a   : > { %v1131_v58 = vpop.f32.mrf.mxu3 }
 0x27b   : > { %1321 = vmatmul.f32.gmra.mxu3 %v1131_v58 }
 0x27d   : > { %v1184_v1 = vpop.f32.mrf.mxu0  ;;  %v1234_v48 = vpop.f32.mrf.mxu1 }
 0x27e   : > { %1365 = vmatmul.f32.gmra.mxu0 %v1184_v1  ;;  %1406 = vmatmul.f32.gmra.mxu1 %v1234_v48 }
 0x27f   : > { %1465 = vmatmul.f32.gmra.mxu2 %v1184_v1 }
 0x282   : > { %v1134_v55 = vpop.f32.mrf.mxu3 }
 0x283   : > { %1324 = vmatmul.f32.gmra.mxu3 %v1134_v55 }
 0x285   : > { %v1187_v6 = vpop.f32.mrf.mxu0  ;;  %v1237_v62 = vpop.f32.mrf.mxu1 }
 0x286   : > { %1368 = vmatmul.f32.gmra.mxu0 %v1187_v6  ;;  %1409 = vmatmul.f32.gmra.mxu1 %v1237_v62 }
 0x287   : > { %1468 = vmatmul.f32.gmra.mxu2 %v1187_v6 }
 0x28a   : > { %v1137_v46 = vpop.f32.mrf.mxu3 }
 0x28b   : > { %1327 = vmatmul.f32.gmra.mxu3 %v1137_v46 }
 0x28d   : > { %v1190_v52 = vpop.f32.mrf.mxu0  ;;  %v1240_v7 = vpop.f32.mrf.mxu1 }
 0x28e   : > { %1371 = vmatmul.f32.gmra.mxu0 %v1190_v52  ;;  %1412 = vmatmul.f32.gmra.mxu1 %v1240_v7 }
 0x28f   : > { %1471 = vmatmul.f32.gmra.mxu2 %v1190_v52 }
 0x292   : > { %v1140_v59 = vpop.f32.mrf.mxu3 }
 0x293   : > { %1330 = vmatmul.f32.gmra.mxu3 %v1140_v59 }
 0x295   : > { %v1193_v44 = vpop.f32.mrf.mxu0  ;;  %v1243_v49 = vpop.f32.mrf.mxu1 }
 0x296   : > { %1374 = vmatmul.f32.gmra.mxu0 %v1193_v44  ;;  %1415 = vmatmul.f32.gmra.mxu1 %v1243_v49 }
 0x297   : > { %1474 = vmatmul.f32.gmra.mxu2 %v1193_v44 }
 0x29a   : > { %v1143_v8 = vpop.f32.mrf.mxu3 }
 0x29b   : > { %1333 = vmatmul.f32.gmra.mxu3 %v1143_v8 }
 0x2db   : > { %v1354_v50 = vpop.f32.mrf.mxu0  ;;  %v1395_v38 = vpop.f32.mrf.mxu1 }
 0x2e3   : > { %v1357_v13 = vpop.f32.mrf.mxu0  ;;  %v1398_v41 = vpop.f32.mrf.mxu1 }
 0x2e6   : > { %v1313_v14 = vpop.f32.mrf.mxu3 }
 0x2e7   : > { %v1314_v39 = vadd.f32 %v2871_v43, %v1313_v14  ;;  %v2714_v14 = vld [vmem:[%s4193_s7 + $0x68] sm:$0xff] }
 0x2e9   : > { %v1355_v16 = vadd.f32 %v1354_v50, %v1314_v39  ;;  %v2712_v50 = vld [vmem:[%s4193_s7 + $0x58] sm:$0xff]  ;;  %v1640_v39 = vld [vmem:[%s4192_s6 + $0x30] sm:$0xff] }
 0x2eb   : > { %v1396_v17 = vadd.f32 %v1395_v38, %v1355_v16  ;;  %v1360_v19 = vpop.f32.mrf.mxu0  ;;  %v1401_v22 = vpop.f32.mrf.mxu1  ;;  %v1490_v38 = vld [vmem:[%s4193_s7 + $0x20] sm:$0xff]  ;;  %v1787_v16 = vld [vmem:[%s4192_s6 + $0xb8] sm:$0xff] }
 0x2ed   : > { %v3678_v20 = vmax.f32 %v1396_v17, 0.0  ;;  %v1639_v17 = vld [vmem:[%s4192_s6 + $0x28] sm:$0xff] }
 0x2ee   : > { %v1316_v21 = vpop.f32.mrf.mxu3 }
 0x2ef   : > { %v1317_v24 = vadd.f32 %v2871_v43, %v1316_v21  ;;  %2725 = vmatmul.msk.f32.vlgmr.msrb.gmra.mxu1 %vm1494_vm1, %v3678_v20  ;;  %v1785_v21 = vld [vmem:[%s4192_s6 + $0xa8] sm:$0xff] }
 0x2f1   : > { %v1358_v25 = vadd.f32 %v1357_v13, %v1317_v24  ;;  %v1641_v13 = vld [vmem:[%s4192_s6 + $0x38] sm:$0xff]  ;;  %v1784_v24 = vld [vmem:[%s4192_s6 + $0xa0] sm:$0xff] }
 0x2f2   : > { %1747 = vmatpush.msrb.mxu2 %v1641_v13 }
 0x2f3   : > { %v1399_v27 = vadd.f32 %v1398_v41, %v1358_v25  ;;  %v1363_v31 = vpop.f32.mrf.mxu0  ;;  %v1404_v26 = vpop.f32.mrf.mxu1  ;;  %v1491_v41 = vld [vmem:[%s4193_s7 + $0x28] sm:$0xff]  ;;  %v1492_v25 = vld [vmem:[%s4193_s7 + $0x30] sm:$0xff] }
 0x2f4   : > { %1748 = vmatpush.msrb.mxu2 %v1640_v39 }
 0x2f5   : > { %v1479_v28 = vmax.f32 %v1399_v27, 0.0  ;;  %v2715_v27 = vld [vmem:[%s4193_s7 + $0x70] sm:$0xff] }
 0x2f6   : > { %v1319_v30 = vpop.f32.mrf.mxu3  ;;  %1749 = vmatpush.msrb.mxu2 %v1639_v17 }
 0x2f7   : > { %v1320_v29 = vadd.f32 %v2871_v43, %v1319_v30  ;;  %2726 = vmatmul.msk.f32.gmra.mxu1 %vm1494_vm1, %v1479_v28  ;;  %v1783_v30 = vld [vmem:[%s4192_s6 + $0x98] sm:$0xff] }
 0x2f9   : > { %v1361_v32 = vadd.f32 %v1360_v19, %v1320_v29  ;;  %v1786_v19 = vld [vmem:[%s4192_s6 + $0xb0] sm:$0xff] }
 0x2fa   : > { %v1782_v29 = vld [vmem:[%s4192_s6 + $0x90] sm:$0xff] }
 0x2fb   : > { %v1402_v33 = vadd.f32 %v1401_v22, %v1361_v32  ;;  %v1366_v23 = vpop.f32.mrf.mxu0  ;;  %v1407_v18 = vpop.f32.mrf.mxu1  ;;  %v1637_v22 = vld [vmem:[%s4192_s6 + $0x18] sm:$0xff] }
 0x2fc   : > { %v2716_v32 = vld [vmem:[%s4193_s7 + $0x78] sm:$0xff] }
 0x2fd   : > { %v1480_v34 = vmax.f32 %v1402_v33, 0.0  ;;  %v1634_v33 = vld [vmem:[%s4192_s6] sm:$0xff] }
 0x2fe   : > { %v1322_v35 = vpop.f32.mrf.mxu3 }
 0x2ff   : > { %v1323_v36 = vadd.f32 %v2871_v43, %v1322_v35  ;;  %2727 = vmatmul.msk.f32.gmra.mxu1 %vm1494_vm1, %v1480_v34  ;;  %v1780_v35 = vld [vmem:[%s4192_s6 + $0x80] sm:$0xff] }
 0x301   : > { %v1364_v37 = vadd.f32 %v1363_v31, %v1323_v36  ;;  %v1635_v31 = vld [vmem:[%s4192_s6 + $0x8] sm:$0xff] }
 0x303   : > { %v1405_v63 = vadd.f32 %v1404_v26, %v1364_v37  ;;  %v1369_v12 = vpop.f32.mrf.mxu0  ;;  %v1410_v0 = vpop.f32.mrf.mxu1  ;;  %v1493_v26 = vld [vmem:[%s4193_s7 + $0x38] sm:$0xff] }
 0x305   : > { %v1481_v2 = vmax.f32 %v1405_v63, 0.0 }
 0x306   : > { %v1325_v15 = vpop.f32.mrf.mxu3 }
 0x307   : > { %v1326_v60 = vadd.f32 %v2871_v43, %v1325_v15  ;;  %2728 = vmatmul.msk.f32.gmra.mxu1 %vm1494_vm1, %v1481_v2 }
 0x309   : > { %v1367_v3 = vadd.f32 %v1366_v23, %v1326_v60 }
 0x30b   : > { %v1408_v57 = vadd.f32 %v1407_v18, %v1367_v3  ;;  %v1372_v51 = vpop.f32.mrf.mxu0  ;;  %v1413_v48 = vpop.f32.mrf.mxu1 }
 0x30d   : > { %v1482_v5 = vmax.f32 %v1408_v57, 0.0 }
 0x30e   : > { %v1328_v9 = vpop.f32.mrf.mxu3 }
 0x30f   : > { %v1329_v54 = vadd.f32 %v2871_v43, %v1328_v9  ;;  %2729 = vmatmul.msk.f32.gmra.mxu1 %vm1494_vm1, %v1482_v5 }
 0x311   : > { %v1370_v61 = vadd.f32 %v1369_v12, %v1329_v54 }
 0x313   : > { %v1411_v4 = vadd.f32 %v1410_v0, %v1370_v61  ;;  %v1375_v7 = vpop.f32.mrf.mxu0  ;;  %v1416_v44 = vpop.f32.mrf.mxu1 }
 0x314   : > { %v3818_v61 = vpop.f32.mrf.mxu2 }
 0x315   : > { %v1483_v58 = vmax.f32 %v1411_v4, 0.0 }
 0x316   : > { %v1331_v1 = vpop.f32.mrf.mxu3 }
 0x317   : > { %v1332_v55 = vadd.f32 %v2871_v43, %v1331_v1  ;;  %2730 = vmatmul.msk.f32.gmra.mxu1 %vm1494_vm1, %v1483_v58 }
 0x319   : > { %v1373_v6 = vadd.f32 %v1372_v51, %v1332_v55 }
 0x31b   : > { %v1414_v62 = vadd.f32 %v1413_v48, %v1373_v6 }
 0x31c   : > { %v3821_v51 = vpop.f32.mrf.mxu2 }
 0x31d   : > { %v1484_v46 = vmax.f32 %v1414_v62, 0.0 }
 0x31e   : > { %v1334_v52 = vpop.f32.mrf.mxu3 }
 0x31f   : > { %v1335_v59 = vadd.f32 %v2871_v43, %v1334_v52  ;;  %2731 = vmatmul.msk.f32.gmra.mxu1 %vm1494_vm1, %v1484_v46  ;;  %v2713_v43 = vld [vmem:[%s4193_s7 + $0x60] sm:$0xff] }
 0x321   : > { %v1376_v49 = vadd.f32 %v1375_v7, %v1335_v59 }
 0x323   : > { %v1417_v8 = vadd.f32 %v1416_v44, %v1376_v49 }
 0x325   : > { %v1485_v56 = vmax.f32 %v1417_v8, 0.0 }
 0x327   : > { %1527 = vmatpush.msrb.mxu3 %v1485_v56  ;;  %1601 = vmatpush.msrb.mxu0 %v1485_v56 }
 0x328   : > { %2732 = vmatmul.msk.f32.gmra.mxu1 %vm1494_vm1, %v1485_v56 }
 0x329   : > { %1528 = vmatpush.msrb.mxu3 %v1484_v46  ;;  %1602 = vmatpush.msrb.mxu0 %v1484_v46 }
 0x32b   : > { %1529 = vmatpush.msrb.mxu3 %v1483_v58  ;;  %1603 = vmatpush.msrb.mxu0 %v1483_v58  ;;  %v3823_v58 = vpop.f32.mrf.mxu2 }
 0x32d   : > { %1530 = vmatpush.msrb.mxu3 %v1482_v5  ;;  %1604 = vmatpush.msrb.mxu0 %v1482_v5 }
 0x32f   : > { %1531 = vmatpush.msrb.mxu3 %v1481_v2  ;;  %1605 = vmatpush.msrb.mxu0 %v1481_v2 }
 0x331   : > { %1532 = vmatpush.msrb.mxu3 %v1480_v34  ;;  %1606 = vmatpush.msrb.mxu0 %v1480_v34  ;;  %v1781_v34 = vld [vmem:[%s4192_s6 + $0x88] sm:$0xff] }
 0x333   : > { %1533 = vmatpush.msrb.mxu3 %v1479_v28  ;;  %1607 = vmatpush.msrb.mxu0 %v1479_v28  ;;  %v1636_v28 = vld [vmem:[%s4192_s6 + $0x10] sm:$0xff]  ;;  %v1463_v1 = vpop.f32.mrf.mxu2 }
 0x335   : > { %1534 = vmatpush.msrb.mxu3 %v3678_v20  ;;  %1608 = vmatpush.msrb.mxu0 %v3678_v20  ;;  %v1638_v20 = vld [vmem:[%s4192_s6 + $0x20] sm:$0xff] }
 0x336   : > { %2701 = vmatmul.msk.f32.vlgmr.msrb.gmra.mxu3 %vm1494_vm1, %v1486_v42  ;;  %2717 = vmatmul.msk.f32.vlgmr.msrb.gmra.mxu0 %vm1494_vm1, %v2709_v47 }
 0x337   : > { %1820 = vmatpush.msra.mxu3 %v1787_v16  ;;  %1750 = vmatpush.msrb.mxu2 %v1638_v20 }
 0x339   : > { %1821 = vmatpush.msra.mxu3 %v1786_v19  ;;  %1751 = vmatpush.msrb.mxu2 %v1637_v22 }
 0x33b   : > { %1822 = vmatpush.msra.mxu3 %v1785_v21  ;;  %1752 = vmatpush.msrb.mxu2 %v1636_v28  ;;  %v1466_v48 = vpop.f32.mrf.mxu2 }
 0x33d   : > { %1823 = vmatpush.msra.mxu3 %v1784_v24  ;;  %1753 = vmatpush.msrb.mxu2 %v1635_v31 }
 0x33e   : > { %2702 = vmatmul.msk.f32.gmra.mxu3 %vm1494_vm1, %v1487_v10  ;;  %2718 = vmatmul.msk.f32.gmra.mxu0 %vm1494_vm1, %v2710_v53 }
 0x33f   : > { %1824 = vmatpush.msra.mxu3 %v1783_v30  ;;  %1754 = vmatpush.msrb.mxu2 %v1634_v33 }
 0x341   : > { %1825 = vmatpush.msra.mxu3 %v1782_v29  ;;  %v2872_v29 = vld [vmem:[%s4201_s15 + $0x2] ss:$0 sm:$0xff] }
 0x343   : > { %1826 = vmatpush.msra.mxu3 %v1781_v34  ;;  %v1469_v55 = vpop.f32.mrf.mxu2 }
 0x345   : > { %1827 = vmatpush.msra.mxu3 %v1780_v35 }
 0x346   : > { %2703 = vmatmul.msk.f32.gmra.mxu3 %vm1494_vm1, %v1488_v40  ;;  %2719 = vmatmul.msk.f32.gmra.mxu0 %vm1494_vm1, %v2711_v45 }
 0x34b   : > { %v1472_v6 = vpop.f32.mrf.mxu2 }
 0x34c   : > { %v1473_v35 = vadd.f32 %v2872_v29, %v1472_v6  ;;  %v1461_v6 = vadd.f32 %v2872_v29, %v3823_v58 }
 0x34e   : > { %2704 = vmatmul.msk.f32.gmra.mxu3 %vm1494_vm1, %v1489_v11  ;;  %2720 = vmatmul.msk.f32.gmra.mxu0 %vm1494_vm1, %v2712_v50 }
 0x353   : > { %v1475_v46 = vpop.f32.mrf.mxu2 }
 0x356   : > { %2705 = vmatmul.msk.f32.gmra.mxu3 %vm1494_vm1, %v1490_v38  ;;  %2721 = vmatmul.msk.f32.gmra.mxu0 %vm1494_vm1, %v2713_v43 }
 0x35e   : > { %2706 = vmatmul.msk.f32.gmra.mxu3 %vm1494_vm1, %v1491_v41  ;;  %2722 = vmatmul.msk.f32.gmra.mxu0 %vm1494_vm1, %v2714_v14 }
 0x366   : > { %2707 = vmatmul.msk.f32.gmra.mxu3 %vm1494_vm1, %v1492_v25  ;;  %2723 = vmatmul.msk.f32.gmra.mxu0 %vm1494_vm1, %v2715_v27  ;;  %v2873_v27 = vld [vmem:[%s4201_s15 + $0x3] ss:$0 sm:$0xff] }
 0x36c   : > { %v1691_v62 = vpop.f32.mrf.mxu1 }
 0x36e   : > { %2708 = vmatmul.msk.f32.gmra.mxu3 %vm1494_vm1, %v1493_v26  ;;  %2724 = vmatmul.msk.f32.gmra.mxu0 %vm1494_vm1, %v2716_v32 }
 0x374   : > { %v1694_v7 = vpop.f32.mrf.mxu1 }
 0x37c   : > { %v1697_v56 = vpop.f32.mrf.mxu1 }
 0x384   : > { %v1700_v10 = vpop.f32.mrf.mxu1 }
 0x38c   : > { %v1703_v11 = vpop.f32.mrf.mxu1 }
 0x394   : > { %v1706_v43 = vpop.f32.mrf.mxu1 }
 0x39c   : > { %v1709_v14 = vpop.f32.mrf.mxu1 }
 0x3a5   : > { %v1712_v20 = vpop.f32.mrf.mxu1 }
 0x3b3   : > { %v1610_v36 = vpop.f32.mrf.mxu0 }
 0x3b4   : > { %2741 = vmatmul.msk.f32.vlgmr.msra.gmra.mxu3 %vm1494_vm1, %v1610_v36  ;;  %v1476_v36 = vadd.f32 %v2872_v29, %v1475_v46 }
 0x3b9   : > { %v1536_v23 = vpop.f32.mrf.mxu3 }
 0x3ba   : > { %2733 = vmatmul.msk.f32.vlgmr.msrb.gmra.mxu2 %vm1494_vm1, %v1536_v23 }
 0x3bb   : > { %v1613_v37 = vpop.f32.mrf.mxu0 }
 0x3bc   : > { %2742 = vmatmul.msk.f32.gmra.mxu3 %vm1494_vm1, %v1613_v37 }
 0x3c1   : > { %v1539_v18 = vpop.f32.mrf.mxu3 }
 0x3c2   : > { %2734 = vmatmul.msk.f32.gmra.mxu2 %vm1494_vm1, %v1539_v18 }
 0x3c3   : > { %v1616_v63 = vpop.f32.mrf.mxu0 }
 0x3c4   : > { %2743 = vmatmul.msk.f32.gmra.mxu3 %vm1494_vm1, %v1616_v63 }
 0x3c9   : > { %v1542_v2 = vpop.f32.mrf.mxu3 }
 0x3ca   : > { %2735 = vmatmul.msk.f32.gmra.mxu2 %vm1494_vm1, %v1542_v2  ;;  %v1470_v2 = vadd.f32 %v2872_v29, %v1469_v55 }
 0x3cb   : > { %v1619_v15 = vpop.f32.mrf.mxu0 }
 0x3cc   : > { %2744 = vmatmul.msk.f32.gmra.mxu3 %vm1494_vm1, %v1619_v15 }
 0x3d1   : > { %v1545_v60 = vpop.f32.mrf.mxu3 }
 0x3d2   : > { %2736 = vmatmul.msk.f32.gmra.mxu2 %vm1494_vm1, %v1545_v60 }
 0x3d3   : > { %v1622_v3 = vpop.f32.mrf.mxu0 }
 0x3d4   : > { %2745 = vmatmul.msk.f32.gmra.mxu3 %vm1494_vm1, %v1622_v3 }
 0x3d9   : > { %v1548_v12 = vpop.f32.mrf.mxu3 }
 0x3da   : > { %2737 = vmatmul.msk.f32.gmra.mxu2 %vm1494_vm1, %v1548_v12 }
 0x3db   : > { %v1625_v57 = vpop.f32.mrf.mxu0 }
 0x3dc   : > { %2746 = vmatmul.msk.f32.gmra.mxu3 %vm1494_vm1, %v1625_v57  ;;  %v1467_v57 = vadd.f32 %v2872_v29, %v1466_v48  ;;  %v1458_v48 = vadd.f32 %v2872_v29, %v3821_v51 }
 0x3e1   : > { %v1551_v0 = vpop.f32.mrf.mxu3 }
 0x3e2   : > { %2738 = vmatmul.msk.f32.gmra.mxu2 %vm1494_vm1, %v1551_v0 }
 0x3e3   : > { %v1628_v5 = vpop.f32.mrf.mxu0 }
 0x3e4   : > { %2747 = vmatmul.msk.f32.gmra.mxu3 %vm1494_vm1, %v1628_v5 }
 0x3e9   : > { %v1554_v9 = vpop.f32.mrf.mxu3 }
 0x3ea   : > { %2739 = vmatmul.msk.f32.gmra.mxu2 %vm1494_vm1, %v1554_v9 }
 0x3eb   : > { %v1631_v54 = vpop.f32.mrf.mxu0 }
 0x3ec   : > { %2748 = vmatmul.msk.f32.gmra.mxu3 %vm1494_vm1, %v1631_v54 }
 0x3f1   : > { %v1557_v4 = vpop.f32.mrf.mxu3 }
 0x3f2   : > { %2740 = vmatmul.msk.f32.gmra.mxu2 %vm1494_vm1, %v1557_v4  ;;  %v1464_v4 = vadd.f32 %v2872_v29, %v1463_v1 }
 0x437   : > { %v1829_v52 = vpop.f32.mrf.mxu3 }
 0x43d   : > { %v1756_v59 = vpop.f32.mrf.mxu2 }
 0x43e   : > { %v1757_v44 = vadd.f32 %v1756_v59, %v1691_v62 }
 0x43f   : > { %v1832_v49 = vpop.f32.mrf.mxu3 }
 0x440   : > { %v3825_v8 = vadd.f32 %v1829_v52, %v1757_v44 }
 0x442   : > { %v1863_v44 = vadd.f32 %v2873_v27, %v3825_v8 }
 0x445   : > { %v1759_v42 = vpop.f32.mrf.mxu2 }
 0x446   : > { %v1760_v23 = vadd.f32 %v1759_v42, %v1694_v7 }
 0x447   : > { %v1835_v47 = vpop.f32.mrf.mxu3 }
 0x448   : > { %v1854_v0 = vadd.f32 %v1832_v49, %v1760_v23  ;;  %v2188_v23 = vld [vmem:[%s4196_s10 + $0x38] sm:$0xff] }
 0x44a   : > { %v1864_v46 = vadd.f32 %v2873_v27, %v1854_v0  ;;  %v2122_v0 = vld [vmem:[%s4194_s8 + $0x80] sm:$0xff] }
 0x44c   : > { %v1872_v42 = vadd.f32 %v1864_v46, %v1458_v48 }
 0x44d   : > { %v1762_v53 = vpop.f32.mrf.mxu2 }
 0x44e   : > { %v1763_v26 = vadd.f32 %v1762_v53, %v1697_v56  ;;  %v1455_v56 = vadd.f32 %v2872_v29, %v3818_v61  ;;  %v1880_v51 = vmax.f32 %v1872_v42, 0.0  ;;  %v1887_v61 = vld [vmem:[%s4195_s9] sm:$0xff]  ;;  %v2329_v42 = vld [vmem:[%s4197_s11 + $0x68] sm:$0xff] }
 0x44f   : > { %v1838_v40 = vpop.f32.mrf.mxu3  ;;  %v2753_v53 = vld [vmem:[%s4195_s9 + $0x20] sm:$0xff] }
 0x450   : > { %v1855_v15 = vadd.f32 %v1835_v47, %v1763_v26  ;;  %v1871_v58 = vadd.f32 %v1863_v44, %v1455_v56  ;;  %v2024_v29 = vld [vmem:[%s4194_s8] sm:$0xff]  ;;  %v2034_v26 = vld [vmem:[%s4194_s8 + $0x50] sm:$0xff] }
 0x451   : > { %v2330_v56 = vld [vmem:[%s4197_s11 + $0x70] sm:$0xff] }
 0x452   : > { %v1865_v62 = vadd.f32 %v2873_v27, %v1855_v15  ;;  %v1879_v8 = vmax.f32 %v1871_v58, 0.0  ;;  %v2186_v15 = vld [vmem:[%s4196_s10 + $0x28] sm:$0xff]  ;;  %v2327_v58 = vld [vmem:[%s4197_s11 + $0x58] sm:$0xff] }
 0x454   : > { %v1873_v49 = vadd.f32 %v1865_v62, %v1461_v6 }
 0x455   : > { %v1765_v45 = vpop.f32.mrf.mxu2 }
 0x456   : > { %v1766_v28 = vadd.f32 %v1765_v45, %v1700_v10  ;;  %v1881_v10 = vmax.f32 %v1873_v49, 0.0  ;;  %v1888_v45 = vld [vmem:[%s4195_s9 + $0x8] sm:$0xff] }
 0x457   : > { %v1841_v50 = vpop.f32.mrf.mxu3 }
 0x458   : > { %v1856_v37 = vadd.f32 %v1838_v40, %v1766_v28  ;;  %v2755_v40 = vld [vmem:[%s4195_s9 + $0x30] sm:$0xff]  ;;  %v2036_v28 = vld [vmem:[%s4194_s8 + $0x60] sm:$0xff] }
 0x45a   : > { %v1866_v5 = vadd.f32 %v2873_v27, %v1856_v37  ;;  %v2126_v37 = vld [vmem:[%s4194_s8 + $0xa0] sm:$0xff] }
 0x45c   : > { %v1874_v55 = vadd.f32 %v1866_v5, %v1464_v4  ;;  %v2183_v5 = vld [vmem:[%s4196_s10 + $0x10] sm:$0xff]  ;;  %v2181_v4 = vld [vmem:[%s4196_s10] sm:$0xff] }
 0x45d   : > { %v1768_v38 = vpop.f32.mrf.mxu2 }
 0x45e   : > { %v1769_v21 = vadd.f32 %v1768_v38, %v1703_v11  ;;  %v1882_v47 = vmax.f32 %v1874_v55, 0.0  ;;  %v2754_v11 = vld [vmem:[%s4195_s9 + $0x28] sm:$0xff]  ;;  %v1889_v38 = vld [vmem:[%s4195_s9 + $0x10] sm:$0xff] }
 0x45f   : > { %v1844_v13 = vpop.f32.mrf.mxu3 }
 0x460   : > { %v1857_v32 = vadd.f32 %v1841_v50, %v1769_v21  ;;  %v2756_v50 = vld [vmem:[%s4195_s9 + $0x38] sm:$0xff]  ;;  %v2028_v21 = vld [vmem:[%s4194_s8 + $0x20] sm:$0xff] }
 0x462   : > { %v1867_v60 = vadd.f32 %v2873_v27, %v1857_v32  ;;  %v2033_v32 = vld [vmem:[%s4194_s8 + $0x48] sm:$0xff] }
 0x464   : > { %v1875_v52 = vadd.f32 %v1867_v60, %v1467_v57  ;;  %v2123_v60 = vld [vmem:[%s4194_s8 + $0x88] sm:$0xff] }
 0x465   : > { %v1771_v41 = vpop.f32.mrf.mxu2 }
 0x466   : > { %v1772_v19 = vadd.f32 %v1771_v41, %v1706_v43  ;;  %v1883_v1 = vmax.f32 %v1875_v52, 0.0  ;;  %v1890_v43 = vld [vmem:[%s4195_s9 + $0x18] sm:$0xff]  ;;  %v2762_v41 = vld [vmem:[%s4195_s9 + $0x48] sm:$0xff] }
 0x467   : > { %v1847_v39 = vpop.f32.mrf.mxu3 }
 0x468   : > { %v1858_v30 = vadd.f32 %v1844_v13, %v1772_v19  ;;  %v2761_v13 = vld [vmem:[%s4195_s9 + $0x40] sm:$0xff]  ;;  %v2029_v19 = vld [vmem:[%s4194_s8 + $0x28] sm:$0xff] }
 0x46a   : > { %v1868_v18 = vadd.f32 %v2873_v27, %v1858_v30  ;;  %v2025_v30 = vld [vmem:[%s4194_s8 + $0x8] sm:$0xff] }
 0x46c   : > { %v1876_v9 = vadd.f32 %v1868_v18, %v1470_v2  ;;  %v2125_v18 = vld [vmem:[%s4194_s8 + $0x98] sm:$0xff]  ;;  %v2124_v2 = vld [vmem:[%s4194_s8 + $0x90] sm:$0xff] }
 0x46d   : > { %v1774_v16 = vpop.f32.mrf.mxu2 }
 0x46e   : > { %v1775_v17 = vadd.f32 %v1774_v16, %v1709_v14  ;;  %v1884_v7 = vmax.f32 %v1876_v9, 0.0  ;;  %v2763_v14 = vld [vmem:[%s4195_s9 + $0x50] sm:$0xff]  ;;  %v2031_v16 = vld [vmem:[%s4194_s8 + $0x38] sm:$0xff] }
 0x46f   : > { %v1850_v25 = vpop.f32.mrf.mxu3  ;;  %2101 = vmatpush.msra.mxu2 %v2031_v16 }
 0x470   : > { %v1859_v22 = vadd.f32 %v1847_v39, %v1775_v17  ;;  %v2764_v39 = vld [vmem:[%s4195_s9 + $0x58] sm:$0xff]  ;;  %v2030_v17 = vld [vmem:[%s4194_s8 + $0x30] sm:$0xff] }
 0x471   : > { %2102 = vmatpush.msra.mxu2 %v2030_v17 }
 0x472   : > { %v1869_v33 = vadd.f32 %v2873_v27, %v1859_v22  ;;  %v2038_v22 = vld [vmem:[%s4194_s8 + $0x70] sm:$0xff] }
 0x473   : > { %2103 = vmatpush.msra.mxu2 %v2029_v19 }
 0x474   : > { %v1877_v3 = vadd.f32 %v1869_v33, %v1473_v35  ;;  %v2032_v33 = vld [vmem:[%s4194_s8 + $0x40] sm:$0xff]  ;;  %v2128_v35 = vld [vmem:[%s4194_s8 + $0xb0] sm:$0xff] }
 0x475   : > { %v1777_v24 = vpop.f32.mrf.mxu2  ;;  %2104 = vmatpush.msra.mxu2 %v2028_v21 }
 0x476   : > { %v1778_v31 = vadd.f32 %v1777_v24, %v1712_v20  ;;  %v1885_v59 = vmax.f32 %v1877_v3, 0.0  ;;  %v2039_v20 = vld [vmem:[%s4194_s8 + $0x78] sm:$0xff]  ;;  %v2185_v3 = vld [vmem:[%s4196_s10 + $0x20] sm:$0xff] }
 0x477   : > { %v2027_v24 = vld [vmem:[%s4194_s8 + $0x18] sm:$0xff] }
 0x478   : > { %v1860_v34 = vadd.f32 %v1850_v25, %v1778_v31  ;;  %2105 = vmatpush.msra.mxu2 %v2027_v24  ;;  %v2037_v25 = vld [vmem:[%s4194_s8 + $0x68] sm:$0xff]  ;;  %v2035_v31 = vld [vmem:[%s4194_s8 + $0x58] sm:$0xff] }
 0x47a   : > { %v1870_v63 = vadd.f32 %v2873_v27, %v1860_v34  ;;  %v2026_v27 = vld [vmem:[%s4194_s8 + $0x10] sm:$0xff]  ;;  %v2129_v34 = vld [vmem:[%s4194_s8 + $0xb8] sm:$0xff] }
 0x47b   : > { %2106 = vmatpush.msra.mxu2 %v2026_v27 }
 0x47c   : > { %v1878_v12 = vadd.f32 %v1870_v63, %v1476_v36  ;;  %v2127_v36 = vld [vmem:[%s4194_s8 + $0xa8] sm:$0xff]  ;;  %v2187_v63 = vld [vmem:[%s4196_s10 + $0x30] sm:$0xff] }
 0x47d   : > { %2107 = vmatpush.msra.mxu2 %v2025_v30 }
 0x47e   : > { %v1886_v54 = vmax.f32 %v1878_v12, 0.0  ;;  %v2184_v12 = vld [vmem:[%s4196_s10 + $0x18] sm:$0xff] }
 0x47f   : > { %2108 = vmatpush.msra.mxu2 %v2024_v29 }
 0x480   : > { %1911 = vmatpush.msra.mxu0 %v1886_v54  ;;  %1957 = vmatpush.msra.mxu1 %v1886_v54 }
 0x481   : > { %2815 = vmatpush.msrb.mxu3 %v1886_v54  ;;  %2823 = vmatpush.msrb.mxu2 %v2188_v23 }
 0x482   : > { %1912 = vmatpush.msra.mxu0 %v1885_v59  ;;  %1958 = vmatpush.msra.mxu1 %v1885_v59 }
 0x483   : > { %2816 = vmatpush.msrb.mxu3 %v1885_v59  ;;  %2824 = vmatpush.msrb.mxu2 %v2187_v63 }
 0x484   : > { %1913 = vmatpush.msra.mxu0 %v1884_v7  ;;  %1959 = vmatpush.msra.mxu1 %v1884_v7 }
 0x485   : > { %2817 = vmatpush.msrb.mxu3 %v1884_v7  ;;  %2825 = vmatpush.msrb.mxu2 %v2186_v15 }
 0x486   : > { %1914 = vmatpush.msra.mxu0 %v1883_v1  ;;  %1960 = vmatpush.msra.mxu1 %v1883_v1 }
 0x487   : > { %2818 = vmatpush.msrb.mxu3 %v1883_v1  ;;  %2826 = vmatpush.msrb.mxu2 %v2185_v3 }
 0x488   : > { %1915 = vmatpush.msra.mxu0 %v1882_v47  ;;  %1961 = vmatpush.msra.mxu1 %v1882_v47 }
 0x489   : > { %2819 = vmatpush.msrb.mxu3 %v1882_v47  ;;  %2827 = vmatpush.msrb.mxu2 %v2184_v12 }
 0x48a   : > { %1916 = vmatpush.msra.mxu0 %v1881_v10  ;;  %1962 = vmatpush.msra.mxu1 %v1881_v10 }
 0x48b   : > { %2820 = vmatpush.msrb.mxu3 %v1881_v10  ;;  %2828 = vmatpush.msrb.mxu2 %v2183_v5 }
 0x48c   : > { %1917 = vmatpush.msra.mxu0 %v1880_v51  ;;  %1963 = vmatpush.msra.mxu1 %v1880_v51 }
 0x48d   : > { %2821 = vmatpush.msrb.mxu3 %v1880_v51 }
 0x48e   : > { %1918 = vmatpush.msra.mxu0 %v1879_v8  ;;  %1964 = vmatpush.msra.mxu1 %v1879_v8 }
 0x48f   : > { %2822 = vmatpush.msrb.mxu3 %v1879_v8  ;;  %2749 = vmatmul.msk.f32.vlgmr.msra.gmra.mxu0 %vm1494_vm1, %v1887_v61 }
 0x490   : > { %2003 = vmatpush.msrb.mxu0 %v1886_v54  ;;  %2757 = vmatmul.msk.f32.vlgmr.msra.gmra.mxu1 %vm1494_vm1, %v2753_v53  ;;  %v2182_v54 = vld [vmem:[%s4196_s10 + $0x8] sm:$0xff] }
 0x491   : > { %2759 = vmatmul.msk.f32.vlgmr.msrb.gmra.mxu3 %vm1494_vm1, %v2755_v40  ;;  %2060 = vmatpush.msrb.mxu1 %v2039_v20 }
 0x492   : > { %2004 = vmatpush.msrb.mxu0 %v1885_v59  ;;  %2150 = vmatpush.msra.mxu3 %v2129_v34 }
 0x493   : > { %2061 = vmatpush.msrb.mxu1 %v2038_v22  ;;  %2829 = vmatpush.msrb.mxu2 %v2182_v54 }
 0x494   : > { %2005 = vmatpush.msrb.mxu0 %v1884_v7  ;;  %2151 = vmatpush.msra.mxu3 %v2128_v35  ;;  %v2323_v35 = vld [vmem:[%s4197_s11 + $0x38] sm:$0xff] }
 0x495   : > { %2062 = vmatpush.msrb.mxu1 %v2037_v25  ;;  %2830 = vmatpush.msrb.mxu2 %v2181_v4 }
 0x496   : > { %2006 = vmatpush.msrb.mxu0 %v1883_v1  ;;  %2152 = vmatpush.msra.mxu3 %v2127_v36  ;;  %v2331_v1 = vld [vmem:[%s4197_s11 + $0x78] sm:$0xff]  ;;  %v2322_v36 = vld [vmem:[%s4197_s11 + $0x30] sm:$0xff] }
 0x497   : > { %2750 = vmatmul.msk.f32.gmra.mxu0 %vm1494_vm1, %v1888_v45  ;;  %2063 = vmatpush.msrb.mxu1 %v2036_v28  ;;  %v2874_v45 = vld [vmem:[%s4201_s15 + $0x4] ss:$0 sm:$0xff] }
 0x498   : > { %2007 = vmatpush.msrb.mxu0 %v1882_v47  ;;  %2758 = vmatmul.msk.f32.gmra.mxu1 %vm1494_vm1, %v2754_v11  ;;  %v2328_v47 = vld [vmem:[%s4197_s11 + $0x60] sm:$0xff] }
 0x499   : > { %2760 = vmatmul.msk.f32.gmra.mxu3 %vm1494_vm1, %v2756_v50  ;;  %2064 = vmatpush.msrb.mxu1 %v2035_v31 }
 0x49a   : > { %2008 = vmatpush.msrb.mxu0 %v1881_v10  ;;  %2153 = vmatpush.msra.mxu3 %v2126_v37  ;;  %v2326_v10 = vld [vmem:[%s4197_s11 + $0x50] sm:$0xff]  ;;  %v2224_v37 = vld [vmem:[%s4198_s12] sm:$0xff] }
 0x49b   : > { %2065 = vmatpush.msrb.mxu1 %v2034_v26 }
 0x49c   : > { %2009 = vmatpush.msrb.mxu0 %v1880_v51  ;;  %2154 = vmatpush.msra.mxu3 %v2125_v18  ;;  %v2325_v51 = vld [vmem:[%s4197_s11 + $0x48] sm:$0xff]  ;;  %v2789_v18 = vld [vmem:[%s4198_s12 + $0x20] sm:$0xff] }
 0x49d   : > { %2066 = vmatpush.msrb.mxu1 %v2033_v32 }
 0x49e   : > { %2010 = vmatpush.msrb.mxu0 %v1879_v8  ;;  %2155 = vmatpush.msra.mxu3 %v2124_v2  ;;  %v2324_v8 = vld [vmem:[%s4197_s11 + $0x40] sm:$0xff]  ;;  %v2421_v2 = vld [vmem:[%s4197_s11 + $0xb8] sm:$0xff] }
 0x49f   : > { %2751 = vmatmul.msk.f32.gmra.mxu0 %vm1494_vm1, %v1889_v38  ;;  %2067 = vmatpush.msrb.mxu1 %v2032_v33 }
 0x4a0   : > { %2199 = vmatpush.msra.mxu0 %v2188_v23  ;;  %2156 = vmatpush.msra.mxu3 %v2123_v60  ;;  %v2321_v23 = vld [vmem:[%s4197_s11 + $0x28] sm:$0xff]  ;;  %v2420_v60 = vld [vmem:[%s4197_s11 + $0xb0] sm:$0xff] }
 0x4a2   : > { %2200 = vmatpush.msra.mxu0 %v2187_v63  ;;  %2157 = vmatpush.msra.mxu3 %v2122_v0  ;;  %v2320_v63 = vld [vmem:[%s4197_s11 + $0x20] sm:$0xff] }
 0x4a3   : > { %v2418_v0 = vld [vmem:[%s4197_s11 + $0xa0] sm:$0xff] }
 0x4a4   : > { %2201 = vmatpush.msra.mxu0 %v2186_v15  ;;  %2352 = vmatpush.msrb.mxu3 %v2331_v1  ;;  %v2319_v15 = vld [vmem:[%s4197_s11 + $0x18] sm:$0xff] }
 0x4a6   : > { %2202 = vmatpush.msra.mxu0 %v2185_v3  ;;  %2353 = vmatpush.msrb.mxu3 %v2330_v56  ;;  %v2318_v3 = vld [vmem:[%s4197_s11 + $0x10] sm:$0xff] }
 0x4a7   : > { %2752 = vmatmul.msk.f32.gmra.mxu0 %vm1494_vm1, %v1890_v43 }
 0x4a8   : > { %2203 = vmatpush.msra.mxu0 %v2184_v12  ;;  %2354 = vmatpush.msrb.mxu3 %v2329_v42  ;;  %v2419_v12 = vld [vmem:[%s4197_s11 + $0xa8] sm:$0xff] }
 0x4aa   : > { %2204 = vmatpush.msra.mxu0 %v2183_v5  ;;  %2355 = vmatpush.msrb.mxu3 %v2328_v47  ;;  %v2225_v5 = vld [vmem:[%s4198_s12 + $0x8] sm:$0xff] }
 0x4ac   : > { %2205 = vmatpush.msra.mxu0 %v2182_v54  ;;  %2356 = vmatpush.msrb.mxu3 %v2327_v58  ;;  %v2226_v54 = vld [vmem:[%s4198_s12 + $0x10] sm:$0xff] }
 0x4ae   : > { %2206 = vmatpush.msra.mxu0 %v2181_v4  ;;  %2357 = vmatpush.msrb.mxu3 %v2326_v10  ;;  %v2791_v4 = vld [vmem:[%s4198_s12 + $0x30] sm:$0xff] }
 0x4af   : > { %2765 = vmatmul.msk.f32.vlgmr.msrb.gmra.mxu0 %vm1494_vm1, %v2761_v13 }
 0x4b0   : > { %2358 = vmatpush.msrb.mxu3 %v2325_v51  ;;  %2393 = vmatpush.msrb.mxu0 %v2323_v35 }
 0x4b2   : > { %2359 = vmatpush.msrb.mxu3 %v2324_v8  ;;  %2394 = vmatpush.msrb.mxu0 %v2322_v36 }
 0x4b4   : > { %2395 = vmatpush.msrb.mxu0 %v2321_v23 }
 0x4b6   : > { %2396 = vmatpush.msrb.mxu0 %v2320_v63 }
 0x4b7   : > { %2766 = vmatmul.msk.f32.gmra.mxu0 %vm1494_vm1, %v2762_v41 }
 0x4b8   : > { %2397 = vmatpush.msrb.mxu0 %v2319_v15 }
 0x4ba   : > { %2398 = vmatpush.msrb.mxu0 %v2318_v3 }
 0x4bf   : > { %2767 = vmatmul.msk.f32.gmra.mxu0 %vm1494_vm1, %v2763_v14 }
 0x4c7   : > { %2768 = vmatmul.msk.f32.gmra.mxu0 %vm1494_vm1, %v2764_v39 }
 0x50c   : > { %v1920_v57 = vpop.f32.mrf.mxu0 }
 0x50d   : > { %2773 = vmatmul.msk.f32.vlgmr.msra.gmra.mxu2 %vm1494_vm1, %v1920_v57  ;;  %v1966_v9 = vpop.f32.mrf.mxu1  ;;  %v2317_v57 = vld [vmem:[%s4197_s11 + $0x8] sm:$0xff] }
 0x50e   : > { %2769 = vmatmul.msk.f32.vlgmr.msrb.gmra.mxu1 %vm1494_vm1, %v1966_v9  ;;  %2781 = vmatmul.msk.f32.vlgmr.msra.gmra.mxu0 %vm1494_vm1, %v1966_v9  ;;  %v2790_v9 = vld [vmem:[%s4198_s12 + $0x28] sm:$0xff] }
 0x50f   : > { %2399 = vmatpush.msrb.mxu0 %v2317_v57 }
 0x514   : > { %v1923_v62 = vpop.f32.mrf.mxu0  ;;  %v1972_v59 = vpop.f32.mrf.mxu3 }
 0x515   : > { %2774 = vmatmul.msk.f32.gmra.mxu2 %vm1494_vm1, %v1923_v62  ;;  %v1969_v52 = vpop.f32.mrf.mxu1  ;;  %v2227_v62 = vld [vmem:[%s4198_s12 + $0x18] sm:$0xff] }
 0x516   : > { %2770 = vmatmul.msk.f32.gmra.mxu1 %vm1494_vm1, %v1969_v52  ;;  %2782 = vmatmul.msk.f32.gmra.mxu0 %vm1494_vm1, %v1969_v52  ;;  %v2792_v52 = vld [vmem:[%s4198_s12 + $0x38] sm:$0xff] }
 0x51c   : > { %v1926_v6 = vpop.f32.mrf.mxu0  ;;  %v1975_v46 = vpop.f32.mrf.mxu3 }
 0x51d   : > { %2775 = vmatmul.msk.f32.gmra.mxu2 %vm1494_vm1, %v1926_v6  ;;  %v2417_v6 = vld [vmem:[%s4197_s11 + $0x98] sm:$0xff] }
 0x51e   : > { %2771 = vmatmul.msk.f32.gmra.mxu1 %vm1494_vm1, %v1972_v59  ;;  %2783 = vmatmul.msk.f32.gmra.mxu0 %vm1494_vm1, %v1972_v59  ;;  %v2316_v59 = vld [vmem:[%s4197_s11] sm:$0xff] }
 0x51f   : > { %2400 = vmatpush.msrb.mxu0 %v2316_v59 }
 0x524   : > { %v1929_v55 = vpop.f32.mrf.mxu0 }
 0x525   : > { %2776 = vmatmul.msk.f32.gmra.mxu2 %vm1494_vm1, %v1929_v55  ;;  %v2415_v55 = vld [vmem:[%s4197_s11 + $0x88] sm:$0xff] }
 0x526   : > { %2772 = vmatmul.msk.f32.gmra.mxu1 %vm1494_vm1, %v1975_v46 }
 0x52c   : > { %v2012_v7 = vpop.f32.mrf.mxu0 }
 0x52d   : > { %2777 = vmatmul.msk.f32.vlgmr.msra.gmra.mxu3 %vm1494_vm1, %v2012_v7  ;;  %2784 = vmatmul.msk.f32.vlgmr.msrb.gmra.mxu2 %vm1494_vm1, %v1975_v46  ;;  %v2416_v46 = vld [vmem:[%s4197_s11 + $0x90] sm:$0xff]  ;;  %v2414_v7 = vld [vmem:[%s4197_s11 + $0x80] sm:$0xff] }
 0x534   : > { %v2015_v48 = vpop.f32.mrf.mxu0 }
 0x535   : > { %2778 = vmatmul.msk.f32.gmra.mxu3 %vm1494_vm1, %v2015_v48 }
 0x53c   : > { %v2018_v44 = vpop.f32.mrf.mxu0 }
 0x53d   : > { %2779 = vmatmul.msk.f32.gmra.mxu3 %vm1494_vm1, %v2018_v44 }
 0x544   : > { %v2021_v49 = vpop.f32.mrf.mxu0 }
 0x545   : > { %2780 = vmatmul.msk.f32.gmra.mxu3 %vm1494_vm1, %v2021_v49 }
 0x58b   : > { %v2069_v61 = vpop.f32.mrf.mxu1  ;;  %v2208_v51 = vpop.f32.mrf.mxu0 }
 0x590   : > { %v2110_v53 = vpop.f32.mrf.mxu2 }
 0x591   : > { %v2111_v40 = vadd.f32 %v2110_v53, %v2069_v61 }
 0x593   : > { %v2072_v11 = vpop.f32.mrf.mxu1  ;;  %v2211_v8 = vpop.f32.mrf.mxu0 }
 0x598   : > { %v2113_v38 = vpop.f32.mrf.mxu2 }
 0x599   : > { %v2114_v14 = vadd.f32 %v2113_v38, %v2072_v11 }
 0x59b   : > { %v2075_v17 = vpop.f32.mrf.mxu1  ;;  %v2214_v61 = vpop.f32.mrf.mxu0 }
 0x5a0   : > { %v2116_v19 = vpop.f32.mrf.mxu2 }
 0x5a1   : > { %v2117_v22 = vadd.f32 %v2116_v19, %v2075_v17  ;;  %v2508_v17 = vld [vmem:[%s4200_s14 + $0x18] sm:$0xff] }
 0x5a3   : > { %v2078_v28 = vpop.f32.mrf.mxu1 }
 0x5a8   : > { %v2119_v30 = vpop.f32.mrf.mxu2 }
 0x5a9   : > { %v2120_v29 = vadd.f32 %v2119_v30, %v2078_v28 }
 0x5b0   : > { %v2159_v50 = vpop.f32.mrf.mxu3  ;;  %v2217_v48 = vpop.f32.mrf.mxu2 }
 0x5b1   : > { %v2171_v43 = vadd.f32 %v2159_v50, %v2111_v40 }
 0x5b3   : > { %v2177_v13 = vadd.f32 %v2874_v45, %v2171_v43  ;;  %v2512_v43 = vld [vmem:[%s4200_s14 + $0x38] sm:$0xff] }
 0x5b5   : > { %v2220_v41 = vmax.f32 %v2177_v13, 0.0  ;;  %v2511_v13 = vld [vmem:[%s4200_s14 + $0x30] sm:$0xff] }
 0x5b7   : > { %2797 = vmatmul.msk.f32.vlgmr.msrb.gmra.mxu3 %vm1494_vm1, %v2220_v41 }
 0x5b8   : > { %v2162_v39 = vpop.f32.mrf.mxu3 }
 0x5b9   : > { %v2172_v16 = vadd.f32 %v2162_v39, %v2114_v14  ;;  %v2510_v14 = vld [vmem:[%s4200_s14 + $0x28] sm:$0xff] }
 0x5bb   : > { %v2178_v20 = vadd.f32 %v2874_v45, %v2172_v16  ;;  %v2509_v16 = vld [vmem:[%s4200_s14 + $0x20] sm:$0xff] }
 0x5bd   : > { %v2221_v21 = vmax.f32 %v2178_v20, 0.0  ;;  %v2507_v20 = vld [vmem:[%s4200_s14 + $0x10] sm:$0xff] }
 0x5bf   : > { %2798 = vmatmul.msk.f32.gmra.mxu3 %vm1494_vm1, %v2221_v21 }
 0x5c0   : > { %v2165_v24 = vpop.f32.mrf.mxu3 }
 0x5c1   : > { %v2173_v25 = vadd.f32 %v2165_v24, %v2117_v22 }
 0x5c3   : > { %v2179_v27 = vadd.f32 %v2874_v45, %v2173_v25  ;;  %v2505_v25 = vld [vmem:[%s4200_s14] sm:$0xff] }
 0x5c5   : > { %v2222_v31 = vmax.f32 %v2179_v27, 0.0 }
 0x5c7   : > { %2799 = vmatmul.msk.f32.gmra.mxu3 %vm1494_vm1, %v2222_v31 }
 0x5c8   : > { %v2168_v26 = vpop.f32.mrf.mxu3 }
 0x5c9   : > { %v2174_v32 = vadd.f32 %v2168_v26, %v2120_v29  ;;  %v2876_v29 = vld [vmem:[%s4201_s15 + $0x6] ss:$0 sm:$0xff] }
 0x5cb   : > { %v2180_v33 = vadd.f32 %v2874_v45, %v2174_v32 }
 0x5cd   : > { %v2223_v34 = vmax.f32 %v2180_v33, 0.0 }
 0x5cf   : > { %2253 = vmatpush.msra.mxu1 %v2223_v34  ;;  %2299 = vmatpush.msra.mxu2 %v2223_v34 }
 0x5d0   : > { %2800 = vmatmul.msk.f32.gmra.mxu3 %vm1494_vm1, %v2223_v34  ;;  %v2875_v34 = vld [vmem:[%s4201_s15 + $0x5] ss:$0 sm:$0xff] }
 0x5d1   : > { %2254 = vmatpush.msra.mxu1 %v2222_v31  ;;  %2300 = vmatpush.msra.mxu2 %v2222_v31  ;;  %v2212_v15 = vadd.f32 %v2875_v34, %v2211_v8  ;;  %v2209_v57 = vadd.f32 %v2875_v34, %v2208_v51 }
 0x5d3   : > { %2255 = vmatpush.msra.mxu1 %v2221_v21  ;;  %2301 = vmatpush.msra.mxu2 %v2221_v21  ;;  %v2506_v21 = vld [vmem:[%s4200_s14 + $0x8] sm:$0xff] }
 0x5d5   : > { %2256 = vmatpush.msra.mxu1 %v2220_v41  ;;  %2302 = vmatpush.msra.mxu2 %v2220_v41 }
 0x5d6   : > { %2785 = vmatmul.msk.f32.vlgmr.msra.gmra.mxu1 %vm2228_vm2, %v2224_v37  ;;  %2793 = vmatmul.msk.f32.vlgmr.msra.gmra.mxu2 %vm2228_vm2, %v2789_v18  ;;  %v2215_v37 = vadd.f32 %v2875_v34, %v2214_v61  ;;  %v2218_v18 = vadd.f32 %v2875_v34, %v2217_v48 }
 0x5d7   : > { %2442 = vmatpush.msrb.mxu1 %v2421_v2 }
 0x5d9   : > { %2443 = vmatpush.msrb.mxu1 %v2420_v60 }
 0x5db   : > { %2444 = vmatpush.msrb.mxu1 %v2419_v12 }
 0x5dd   : > { %2445 = vmatpush.msrb.mxu1 %v2418_v0 }
 0x5de   : > { %2786 = vmatmul.msk.f32.gmra.mxu1 %vm2228_vm2, %v2225_v5  ;;  %2794 = vmatmul.msk.f32.gmra.mxu2 %vm2228_vm2, %v2790_v9 }
 0x5df   : > { %2446 = vmatpush.msrb.mxu1 %v2417_v6  ;;  %v2877_v6 = vld [vmem:[%s4201_s15 + $0x7] ss:$0 sm:$0xff] }
 0x5e1   : > { %2447 = vmatpush.msrb.mxu1 %v2416_v46 }
 0x5e3   : > { %2448 = vmatpush.msrb.mxu1 %v2415_v55 }
 0x5e5   : > { %2449 = vmatpush.msrb.mxu1 %v2414_v7 }
 0x5e6   : > { %2787 = vmatmul.msk.f32.gmra.mxu1 %vm2228_vm2, %v2226_v54  ;;  %2795 = vmatmul.msk.f32.gmra.mxu2 %vm2228_vm2, %v2791_v4 }
 0x5e7   : > { %2526 = vmatpush.msra.mxu1 %v2512_v43 }
 0x5e9   : > { %2527 = vmatpush.msra.mxu1 %v2511_v13 }
 0x5eb   : > { %2528 = vmatpush.msra.mxu1 %v2510_v14 }
 0x5ed   : > { %2529 = vmatpush.msra.mxu1 %v2509_v16 }
 0x5ee   : > { %2788 = vmatmul.msk.f32.gmra.mxu1 %vm2228_vm2, %v2227_v62  ;;  %2796 = vmatmul.msk.f32.gmra.mxu2 %vm2228_vm2, %v2792_v52  ;;  %v2481_v52 = vld [vmem:[%s4199_s13] sm:$0xff] }
 0x5ef   : > { %2530 = vmatpush.msra.mxu1 %v2508_v17 }
 0x5f1   : > { %2531 = vmatpush.msra.mxu1 %v2507_v20 }
 0x5f3   : > { %2532 = vmatpush.msra.mxu1 %v2506_v21 }
 0x5f5   : > { %2533 = vmatpush.msra.mxu1 %v2505_v25 }
 0x63a   : > { %v2361_v53 = vpop.f32.mrf.mxu3 }
 0x642   : > { %v2364_v11 = vpop.f32.mrf.mxu3 }
 0x64a   : > { %v2367_v39 = vpop.f32.mrf.mxu3 }
 0x653   : > { %v2258_v44 = vpop.f32.mrf.mxu1  ;;  %v2370_v30 = vpop.f32.mrf.mxu3 }
 0x654   : > { %2801 = vmatmul.msk.f32.vlgmr.msrb.gmra.mxu0 %vm1494_vm1, %v2258_v44 }
 0x659   : > { %v2304_v49 = vpop.f32.mrf.mxu2 }
 0x65a   : > { %2805 = vmatmul.msk.f32.vlgmr.msrb.gmra.mxu1 %vm1494_vm1, %v2304_v49 }
 0x65b   : > { %v2261_v1 = vpop.f32.mrf.mxu1 }
 0x65c   : > { %2802 = vmatmul.msk.f32.gmra.mxu0 %vm1494_vm1, %v2261_v1 }
 0x661   : > { %v2307_v56 = vpop.f32.mrf.mxu2 }
 0x662   : > { %2806 = vmatmul.msk.f32.gmra.mxu1 %vm1494_vm1, %v2307_v56 }
 0x663   : > { %v2264_v42 = vpop.f32.mrf.mxu1 }
 0x664   : > { %2803 = vmatmul.msk.f32.gmra.mxu0 %vm1494_vm1, %v2264_v42 }
 0x669   : > { %v2310_v47 = vpop.f32.mrf.mxu2 }
 0x66a   : > { %2807 = vmatmul.msk.f32.gmra.mxu1 %vm1494_vm1, %v2310_v47 }
 0x66b   : > { %v2267_v58 = vpop.f32.mrf.mxu1 }
 0x66c   : > { %2804 = vmatmul.msk.f32.gmra.mxu0 %vm1494_vm1, %v2267_v58 }
 0x671   : > { %v2313_v10 = vpop.f32.mrf.mxu2 }
 0x672   : > { %2808 = vmatmul.msk.f32.gmra.mxu1 %vm1494_vm1, %v2313_v10 }
 0x6d1   : > { %v2402_v40 = vpop.f32.mrf.mxu0 }
 0x6d2   : > { %v2403_v31 = vadd.f32 %v2402_v40, %v2361_v53 }
 0x6d7   : > { %v2451_v45 = vpop.f32.mrf.mxu1 }
 0x6d8   : > { %v2463_v35 = vadd.f32 %v2451_v45, %v2403_v31 }
 0x6d9   : > { %v2405_v50 = vpop.f32.mrf.mxu0 }
 0x6da   : > { %v2406_v27 = vadd.f32 %v2405_v50, %v2364_v11  ;;  %v2469_v60 = vadd.f32 %v2876_v29, %v2463_v35 }
 0x6dc   : > { %v2473_v54 = vadd.f32 %v2469_v60, %v2209_v57 }
 0x6de   : > { %v2477_v62 = vmax.f32 %v2473_v54, 0.0 }
 0x6df   : > { %v2454_v38 = vpop.f32.mrf.mxu1 }
 0x6e0   : > { %v2464_v26 = vadd.f32 %v2454_v38, %v2406_v27 }
 0x6e1   : > { %v2408_v41 = vpop.f32.mrf.mxu0 }
 0x6e2   : > { %v2409_v22 = vadd.f32 %v2408_v41, %v2367_v39  ;;  %v2470_v63 = vadd.f32 %v2876_v29, %v2464_v26 }
 0x6e4   : > { %v2474_v5 = vadd.f32 %v2470_v63, %v2212_v15 }
 0x6e6   : > { %v2478_v4 = vmax.f32 %v2474_v5, 0.0 }
 0x6e7   : > { %v2457_v19 = vpop.f32.mrf.mxu1 }
 0x6e8   : > { %v2465_v28 = vadd.f32 %v2457_v19, %v2409_v22 }
 0x6e9   : > { %v2411_v24 = vpop.f32.mrf.mxu0 }
 0x6ea   : > { %v2412_v32 = vadd.f32 %v2411_v24, %v2370_v30  ;;  %v2471_v36 = vadd.f32 %v2876_v29, %v2465_v28 }
 0x6ec   : > { %v2475_v12 = vadd.f32 %v2471_v36, %v2215_v37 }
 0x6ee   : > { %v2479_v9 = vmax.f32 %v2475_v12, 0.0 }
 0x6ef   : > { %v2460_v33 = vpop.f32.mrf.mxu1 }
 0x6f0   : > { %v2466_v23 = vadd.f32 %v2460_v33, %v2412_v32 }
 0x6f2   : > { %v2472_v2 = vadd.f32 %v2876_v29, %v2466_v23 }
 0x6f4   : > { %v2476_v3 = vadd.f32 %v2472_v2, %v2218_v18 }
 0x6f6   : > { %v2480_v0 = vmax.f32 %v2476_v3, 0.0 }
 0x6f8   : > { %2497 = vmatpush.msrb.mxu2 %v2480_v0 }
 0x6fa   : > { %2498 = vmatpush.msrb.mxu2 %v2479_v9 }
 0x6fc   : > { %2499 = vmatpush.msrb.mxu2 %v2478_v4 }
 0x6fe   : > { %2500 = vmatpush.msrb.mxu2 %v2477_v62 }
 0x6ff   : > { %2809 = vmatmul.msk.f32.vlgmr.msrb.gmra.mxu2 %vm2228_vm2, %v2481_v52 }
 0x782   : > { %v2502_v59 = vpop.f32.mrf.mxu2 }
 0x783   : > { %2810 = vmatmul.msk.f32.vlgmr.msra.gmra.mxu1 %vm1494_vm1, %v2502_v59 }
 0x800   : > { %v2535_v46 = vpop.f32.mrf.mxu1 }
 0x801   : > { %v2536_v55 = vadd.f32 %v2877_v6, %v2535_v46 }
 0x803   : > { %2538 = vst [vmem:[%s515_s18] sm:$0xff] %v2536_v55 }
 0x804   : > { %2905 = shalt.err (!%p2902_p3)
}
 0x805   : > { %2831 = dma.vmem_to_hbm [thread:$0]  (%p3065_p5), %s2553_s1, 128, %s2555_s17, %s2540_s2  }
 0x806 PF: > { %p2837_p4 = scmp.ge.s32.totalorder %s2940_s24, 2  ;;  %s2566_s23 = sand.u32 1, %s2928_s21  }
 0x807   : > { %s2567_s30 = scalar_lea.sflag [#allocation3], %s2566_s23 }
 0x808   : > { %p2834_p7 = pnand %p2837_p4, %p3069_p6 }
 0x80a   : > { %p2835_p8 = pneg %p2834_p7 }
 0x80c   : > { %2923 = dma.done.wait (%p2835_p8), %s2567_s30, 128  }
 0x80d   : > { %2925 = vsyncadd (%p2835_p8), %s2567_s30, 4294967168  ;;  %s4222_s24 = sld [smem:[#allocation6_spill]]  ;;  %s4225_s21 = smov %s2932_s22 }
 0x80e   : > { %s4223_s3 = sld [smem:[#allocation5_spill]] }
 0x80f   : > { %s4224_s23 = sld [smem:[#allocation7_spill]] }
 0x813   : > { %p26_p9 = scmp.ge.s32.totalorder %s4222_s24, 4  }
 0x814   : > { %s4226_s22 = smov %s4223_s3 }
 0x815   :  { %28 = sbr.rel (!%p26_p9) target bundleno = 8 (0x8), region = 126 }
 0x81a   :  { %2573 = vsyncpa [#allocation3], 1 }
 0x81b   :  { %2575 = vsyncpa [#allocation3 + $0x1], 1 }

</bundles_post_ra>
